<compile_context>
chip_gen: v5e
topology: v5e:2x2
jax: 0.10.0
libtpu: 0.0.40
codegen_flags: <defaults>
</compile_context>

<pallas_src>
import functools

import jax
import jax.numpy as jnp
from jax import lax
from jax.experimental import pallas as pl
from jax.experimental.pallas import tpu as pltpu

INPUT_SIZE = 28
HIDDEN = 64
NUM_CLASSES = 10

# TPU-friendly padded sizes (lane = 128, sublane = 8).
D_PAD = 128    # input feature dim 28 -> 128 (lane-dense x / W_ih rows)
H_PAD = 128    # per-gate width 64 -> 128 so gate slices are 128-lane aligned
NC_PAD = 128   # logits 10 -> 128 so the output store is lane-dense
B_SUB = 8      # sublane granularity for batch padding


def lstm_kernel(x_ref, wih_ref, whh_ref, b_ref, wout_ref, bout_ref,
                out_ref, xproj_sc, *, seq_len, batch_pad):
    """Whole LSTM forward (all timesteps) in one kernel invocation.

    x_ref:    (T*B_pad, D_PAD)     flattened time-major input (zero padded)
    wih_ref:  (D_PAD, 4*H_PAD)     input->gates weight (transposed, gate-padded)
    whh_ref:  (H_PAD, 4*H_PAD)     hidden->gates weight (transposed, gate-padded)
    b_ref:    (1, 4*H_PAD)         combined bias b_ih + b_hh (gate-padded)
    wout_ref: (H_PAD, NC_PAD)      final linear weight (transposed, padded)
    bout_ref: (1, NC_PAD)          final linear bias (padded)
    out_ref:  (B_pad, NC_PAD)      logits (lane-dense, padded)
    xproj_sc: (T*B_pad, 4*H_PAD)   VMEM scratch for the hoisted input projection
    """
    # Input projection has no recurrent dependency: one big MXU push for all
    # timesteps, bias folded in, off the serial critical path.
    xproj_sc[...] = (
        jnp.dot(x_ref[...], wih_ref[...], preferred_element_type=jnp.float32)
        + b_ref[...])

    h0 = jnp.zeros((batch_pad, H_PAD), jnp.float32)
    c0 = jnp.zeros((batch_pad, H_PAD), jnp.float32)

    def step(t, carry):
        h, c = carry
        # Only true recurrent work: h @ W_hh plus the precomputed projection.
        gates = xproj_sc[pl.ds(t * batch_pad, batch_pad), :] + jnp.dot(
            h, whh_ref[...], preferred_element_type=jnp.float32)
        # 128-lane-aligned gate slices (each gate padded 64 -> 128 lanes; the
        # padded lanes stay identically zero through the recurrence).
        i_g = jax.nn.sigmoid(gates[:, 0 * H_PAD:1 * H_PAD])
        f_g = jax.nn.sigmoid(gates[:, 1 * H_PAD:2 * H_PAD])
        g_g = jnp.tanh(gates[:, 2 * H_PAD:3 * H_PAD])
        o_g = jax.nn.sigmoid(gates[:, 3 * H_PAD:4 * H_PAD])
        c_new = f_g * c + i_g * g_g
        h_new = o_g * jnp.tanh(c_new)
        return h_new, c_new

    h_last, _ = lax.fori_loop(0, seq_len, step, (h0, c0), unroll=True)

    logits = (jnp.dot(h_last, wout_ref[...],
                      preferred_element_type=jnp.float32) + bout_ref[...])
    out_ref[...] = logits.astype(out_ref.dtype)


def _pad_gate_cols(w):
    """(K, 4*HIDDEN) -> (K, 4*H_PAD): each 64-wide gate block padded to 128."""
    blocks = []
    for g in range(4):
        blk = w[:, g * HIDDEN:(g + 1) * HIDDEN]
        blocks.append(jnp.pad(blk, ((0, 0), (0, H_PAD - HIDDEN))))
    return jnp.concatenate(blocks, axis=1)


def rnn_forward(x_btd, params):
    """x_btd: (B, T, INPUT_SIZE) float32, batch_first like the PyTorch module."""
    B, T, D = x_btd.shape
    assert D == INPUT_SIZE
    B_pad = max(B_SUB, ((B + B_SUB - 1) // B_SUB) * B_SUB)

    # batch_first -> time-major, pad batch + feature dims, flatten rows.
    x_tbd = jnp.transpose(x_btd, (1, 0, 2))                          # (T, B, D)
    x_tbd = jnp.pad(x_tbd, ((0, 0), (0, B_pad - B), (0, D_PAD - D)))
    x2d = x_tbd.reshape(T * B_pad, D_PAD)                            # lane-dense

    wih_p = _pad_gate_cols(
        jnp.pad(params["w_ih"].T, ((0, D_PAD - INPUT_SIZE), (0, 0))))
    whh_p = _pad_gate_cols(
        jnp.pad(params["w_hh"].T, ((0, H_PAD - HIDDEN), (0, 0))))
    b_p = _pad_gate_cols(
        (params["b_ih"] + params["b_hh"]).reshape(1, 4 * HIDDEN))
    wout_p = jnp.pad(params["w_out"].T,
                     ((0, H_PAD - HIDDEN), (0, NC_PAD - NUM_CLASSES)))
    bout_p = jnp.pad(params["b_out"],
                     (0, NC_PAD - NUM_CLASSES)).reshape(1, NC_PAD)

    kernel = functools.partial(lstm_kernel, seq_len=T, batch_pad=B_pad)
    vmem = lambda: pl.BlockSpec(memory_space=pltpu.MemorySpace.VMEM)

    out = pl.pallas_call(
        kernel,
        out_shape=jax.ShapeDtypeStruct((B_pad, NC_PAD), jnp.float32),
        in_specs=[vmem() for _ in range(6)],
        out_specs=vmem(),
        scratch_shapes=[pltpu.VMEM((T * B_pad, 4 * H_PAD), jnp.float32)],
    )(x2d, wih_p, whh_p, b_p, wout_p, bout_p)

    return out[:B, :NUM_CLASSES]


def rnn_reference(x_btd, params):
    """Pure-JAX reference matching nn.LSTM(batch_first) + nn.Linear on last step."""
    wih, whh = params["w_ih"], params["w_hh"]
    b = params["b_ih"] + params["b_hh"]
    B = x_btd.shape[0]

    def step(carry, x_t):
        h, c = carry
        gates = x_t @ wih.T + h @ whh.T + b
        i = jax.nn.sigmoid(gates[:, 0 * HIDDEN:1 * HIDDEN])
        f = jax.nn.sigmoid(gates[:, 1 * HIDDEN:2 * HIDDEN])
        g = jnp.tanh(gates[:, 2 * HIDDEN:3 * HIDDEN])
        o = jax.nn.sigmoid(gates[:, 3 * HIDDEN:4 * HIDDEN])
        c = f * c + i * g
        h = o * jnp.tanh(c)
        return (h, c), None

    h0 = jnp.zeros((B, HIDDEN), jnp.float32)
    c0 = jnp.zeros((B, HIDDEN), jnp.float32)
    (h_T, _), _ = lax.scan(step, (h0, c0), jnp.transpose(x_btd, (1, 0, 2)))
    return h_T @ params["w_out"].T + params["b_out"]


def init_params(key):
    """Deterministic init mirroring nn.LSTM / nn.Linear parameter shapes."""
    ks = jax.random.split(key, 6)
    bound = 1.0 / jnp.sqrt(HIDDEN)
    u = lambda k, shape: jax.random.uniform(
        k, shape, minval=-bound, maxval=bound, dtype=jnp.float32)
    return {
        "w_ih": u(ks[0], (4 * HIDDEN, INPUT_SIZE)),
        "w_hh": u(ks[1], (4 * HIDDEN, HIDDEN)),
        "b_ih": u(ks[2], (4 * HIDDEN,)),
        "b_hh": u(ks[3], (4 * HIDDEN,)),
        "w_out": u(ks[4], (NUM_CLASSES, HIDDEN)),
        "b_out": u(ks[5], (NUM_CLASSES,)),
    }


if __name__ == "__main__":
    key = jax.random.PRNGKey(0)
    k_x, k_p = jax.random.split(key)

    B, T = 2, 8
    x = jax.random.normal(k_x, (B, T, INPUT_SIZE), dtype=jnp.float32)
    params = init_params(k_p)

    out = rnn_forward(x, params)
    jax.block_until_ready(out)
    assert out.shape == (B, NUM_CLASSES)

    ref = rnn_reference(x, params)
    assert jnp.allclose(out, ref, atol=2e-3, rtol=2e-3), (
        f"max abs err {jnp.max(jnp.abs(out - ref))}")
    print("KERNEL_OK")
</pallas_src>

<mosaic_0001>
module attributes {stable_mosaic.version = 11 : i64} {
  func.func @lstm_kernel(%arg0: memref<64x128xf32, #tpu.memory_space<vmem>>, %arg1: memref<128x512xf32, #tpu.memory_space<vmem>>, %arg2: memref<128x512xf32, #tpu.memory_space<vmem>>, %arg3: memref<1x512xf32, #tpu.memory_space<vmem>>, %arg4: memref<128x128xf32, #tpu.memory_space<vmem>>, %arg5: memref<1x128xf32, #tpu.memory_space<vmem>>, %arg6: memref<8x128xf32, #tpu.memory_space<vmem>>, %arg7: memref<64x512xf32, #tpu.memory_space<vmem>>) attributes {dimension_semantics = [], scalar_prefetch = 0 : i64, scratch_operands = 1 : i64, tpu.core_type = #tpu.core_type<tc>} {
    %c0 = arith.constant 0 : index
    %c0_0 = arith.constant 0 : index
    %0 = vector.load %arg0[%c0, %c0_0] : memref<64x128xf32, #tpu.memory_space<vmem>>, vector<64x128xf32>
    %c0_1 = arith.constant 0 : index
    %c0_2 = arith.constant 0 : index
    %1 = vector.load %arg1[%c0_1, %c0_2] : memref<128x512xf32, #tpu.memory_space<vmem>>, vector<128x512xf32>
    %cst = arith.constant dense<0.000000e+00> : vector<64x512xf32>
    %2 = tpu.matmul %0, %1, %cst {dimension_numbers = #tpu.dot_dimension_numbers<[1], [0], [0], [1], [0, 0, 1, 1], [], []>} : vector<64x128xf32>, vector<128x512xf32>, vector<64x512xf32> -> vector<64x512xf32>
    %c0_3 = arith.constant 0 : index
    %c0_4 = arith.constant 0 : index
    %3 = vector.load %arg3[%c0_3, %c0_4] : memref<1x512xf32, #tpu.memory_space<vmem>>, vector<1x512xf32>
    %4 = vector.broadcast %3 : vector<1x512xf32> to vector<64x512xf32>
    %5 = arith.addf %2, %4 : vector<64x512xf32>
    %c0_5 = arith.constant 0 : index
    %c0_6 = arith.constant 0 : index
    %6 = vector.load %arg7[%c0_5, %c0_6] : memref<64x512xf32, #tpu.memory_space<vmem>>, vector<64x512xf32>
    tpu.vector_store %arg7[%c0_5, %c0_6], %5 {strides = array<i32>} : memref<64x512xf32, #tpu.memory_space<vmem>>, vector<64x512xf32>,
    %cst_7 = arith.constant 0.000000e+00 : f32
    %7 = vector.broadcast %cst_7 : f32 to vector<8x128xf32>
    %cst_8 = arith.constant 0.000000e+00 : f32
    %8 = vector.broadcast %cst_8 : f32 to vector<8x128xf32>
    %c0_i32 = arith.constant 0 : i32
    %c8_i32 = arith.constant 8 : i32
    %9 = arith.muli %c0_i32, %c8_i32 : i32
    %10 = arith.index_cast %9 : i32 to index
    %c0_9 = arith.constant 0 : index
    %11 = vector.load %arg7[%10, %c0_9] : memref<64x512xf32, #tpu.memory_space<vmem>>, vector<8x512xf32>
    %c0_10 = arith.constant 0 : index
    %c0_11 = arith.constant 0 : index
    %12 = vector.load %arg2[%c0_10, %c0_11] : memref<128x512xf32, #tpu.memory_space<vmem>>, vector<128x512xf32>
    %cst_12 = arith.constant dense<0.000000e+00> : vector<8x512xf32>
    %13 = tpu.matmul %7, %12, %cst_12 {dimension_numbers = #tpu.dot_dimension_numbers<[1], [0], [0], [1], [0, 0, 1, 1], [], []>} : vector<8x128xf32>, vector<128x512xf32>, vector<8x512xf32> -> vector<8x512xf32>
    %14 = arith.addf %11, %13 : vector<8x512xf32>
    %15 = vector.extract_strided_slice %14 {offsets = [0, 0], sizes = [8, 128], strides = [1, 1]} : vector<8x512xf32> to vector<8x128xf32>
    %16 = arith.negf %15 : vector<8x128xf32>
    %17 = math.exp %16 : vector<8x128xf32>
    %cst_13 = arith.constant 1.000000e+00 : f32
    %18 = vector.broadcast %cst_13 : f32 to vector<8x128xf32>
    %19 = arith.addf %18, %17 : vector<8x128xf32>
    %20 = arith.divf %18, %19 : vector<8x128xf32>
    %21 = vector.extract_strided_slice %14 {offsets = [0, 128], sizes = [8, 128], strides = [1, 1]} : vector<8x512xf32> to vector<8x128xf32>
    %22 = arith.negf %21 : vector<8x128xf32>
    %23 = math.exp %22 : vector<8x128xf32>
    %cst_14 = arith.constant 1.000000e+00 : f32
    %24 = vector.broadcast %cst_14 : f32 to vector<8x128xf32>
    %25 = arith.addf %24, %23 : vector<8x128xf32>
    %26 = arith.divf %24, %25 : vector<8x128xf32>
    %27 = vector.extract_strided_slice %14 {offsets = [0, 256], sizes = [8, 128], strides = [1, 1]} : vector<8x512xf32> to vector<8x128xf32>
    %28 = math.tanh %27 : vector<8x128xf32>
    %29 = vector.extract_strided_slice %14 {offsets = [0, 384], sizes = [8, 128], strides = [1, 1]} : vector<8x512xf32> to vector<8x128xf32>
    %30 = arith.negf %29 : vector<8x128xf32>
    %31 = math.exp %30 : vector<8x128xf32>
    %cst_15 = arith.constant 1.000000e+00 : f32
    %32 = vector.broadcast %cst_15 : f32 to vector<8x128xf32>
    %33 = arith.addf %32, %31 : vector<8x128xf32>
    %34 = arith.divf %32, %33 : vector<8x128xf32>
    %35 = arith.mulf %26, %8 : vector<8x128xf32>
    %36 = arith.mulf %20, %28 : vector<8x128xf32>
    %37 = arith.addf %35, %36 : vector<8x128xf32>
    %38 = math.tanh %37 : vector<8x128xf32>
    %39 = arith.mulf %34, %38 : vector<8x128xf32>
    %c1_i32 = arith.constant 1 : i32
    %c8_i32_16 = arith.constant 8 : i32
    %40 = arith.muli %c1_i32, %c8_i32_16 : i32
    %41 = arith.index_cast %40 : i32 to index
    %c0_17 = arith.constant 0 : index
    %42 = vector.load %arg7[%41, %c0_17] : memref<64x512xf32, #tpu.memory_space<vmem>>, vector<8x512xf32>
    %c0_18 = arith.constant 0 : index
    %c0_19 = arith.constant 0 : index
    %43 = vector.load %arg2[%c0_18, %c0_19] : memref<128x512xf32, #tpu.memory_space<vmem>>, vector<128x512xf32>
    %cst_20 = arith.constant dense<0.000000e+00> : vector<8x512xf32>
    %44 = tpu.matmul %39, %43, %cst_20 {dimension_numbers = #tpu.dot_dimension_numbers<[1], [0], [0], [1], [0, 0, 1, 1], [], []>} : vector<8x128xf32>, vector<128x512xf32>, vector<8x512xf32> -> vector<8x512xf32>
    %45 = arith.addf %42, %44 : vector<8x512xf32>
    %46 = vector.extract_strided_slice %45 {offsets = [0, 0], sizes = [8, 128], strides = [1, 1]} : vector<8x512xf32> to vector<8x128xf32>
    %47 = arith.negf %46 : vector<8x128xf32>
    %48 = math.exp %47 : vector<8x128xf32>
    %cst_21 = arith.constant 1.000000e+00 : f32
    %49 = vector.broadcast %cst_21 : f32 to vector<8x128xf32>
    %50 = arith.addf %49, %48 : vector<8x128xf32>
    %51 = arith.divf %49, %50 : vector<8x128xf32>
    %52 = vector.extract_strided_slice %45 {offsets = [0, 128], sizes = [8, 128], strides = [1, 1]} : vector<8x512xf32> to vector<8x128xf32>
    %53 = arith.negf %52 : vector<8x128xf32>
    %54 = math.exp %53 : vector<8x128xf32>
    %cst_22 = arith.constant 1.000000e+00 : f32
    %55 = vector.broadcast %cst_22 : f32 to vector<8x128xf32>
    %56 = arith.addf %55, %54 : vector<8x128xf32>
    %57 = arith.divf %55, %56 : vector<8x128xf32>
    %58 = vector.extract_strided_slice %45 {offsets = [0, 256], sizes = [8, 128], strides = [1, 1]} : vector<8x512xf32> to vector<8x128xf32>
    %59 = math.tanh %58 : vector<8x128xf32>
    %60 = vector.extract_strided_slice %45 {offsets = [0, 384], sizes = [8, 128], strides = [1, 1]} : vector<8x512xf32> to vector<8x128xf32>
    %61 = arith.negf %60 : vector<8x128xf32>
    %62 = math.exp %61 : vector<8x128xf32>
    %cst_23 = arith.constant 1.000000e+00 : f32
    %63 = vector.broadcast %cst_23 : f32 to vector<8x128xf32>
    %64 = arith.addf %63, %62 : vector<8x128xf32>
    %65 = arith.divf %63, %64 : vector<8x128xf32>
    %66 = arith.mulf %57, %37 : vector<8x128xf32>
    %67 = arith.mulf %51, %59 : vector<8x128xf32>
    %68 = arith.addf %66, %67 : vector<8x128xf32>
    %69 = math.tanh %68 : vector<8x128xf32>
    %70 = arith.mulf %65, %69 : vector<8x128xf32>
    %c2_i32 = arith.constant 2 : i32
    %c8_i32_24 = arith.constant 8 : i32
    %71 = arith.muli %c2_i32, %c8_i32_24 : i32
    %72 = arith.index_cast %71 : i32 to index
    %c0_25 = arith.constant 0 : index
    %73 = vector.load %arg7[%72, %c0_25] : memref<64x512xf32, #tpu.memory_space<vmem>>, vector<8x512xf32>
    %c0_26 = arith.constant 0 : index
    %c0_27 = arith.constant 0 : index
    %74 = vector.load %arg2[%c0_26, %c0_27] : memref<128x512xf32, #tpu.memory_space<vmem>>, vector<128x512xf32>
    %cst_28 = arith.constant dense<0.000000e+00> : vector<8x512xf32>
    %75 = tpu.matmul %70, %74, %cst_28 {dimension_numbers = #tpu.dot_dimension_numbers<[1], [0], [0], [1], [0, 0, 1, 1], [], []>} : vector<8x128xf32>, vector<128x512xf32>, vector<8x512xf32> -> vector<8x512xf32>
    %76 = arith.addf %73, %75 : vector<8x512xf32>
    %77 = vector.extract_strided_slice %76 {offsets = [0, 0], sizes = [8, 128], strides = [1, 1]} : vector<8x512xf32> to vector<8x128xf32>
    %78 = arith.negf %77 : vector<8x128xf32>
    %79 = math.exp %78 : vector<8x128xf32>
    %cst_29 = arith.constant 1.000000e+00 : f32
    %80 = vector.broadcast %cst_29 : f32 to vector<8x128xf32>
    %81 = arith.addf %80, %79 : vector<8x128xf32>
    %82 = arith.divf %80, %81 : vector<8x128xf32>
    %83 = vector.extract_strided_slice %76 {offsets = [0, 128], sizes = [8, 128], strides = [1, 1]} : vector<8x512xf32> to vector<8x128xf32>
    %84 = arith.negf %83 : vector<8x128xf32>
    %85 = math.exp %84 : vector<8x128xf32>
    %cst_30 = arith.constant 1.000000e+00 : f32
    %86 = vector.broadcast %cst_30 : f32 to vector<8x128xf32>
    %87 = arith.addf %86, %85 : vector<8x128xf32>
    %88 = arith.divf %86, %87 : vector<8x128xf32>
    %89 = vector.extract_strided_slice %76 {offsets = [0, 256], sizes = [8, 128], strides = [1, 1]} : vector<8x512xf32> to vector<8x128xf32>
    %90 = math.tanh %89 : vector<8x128xf32>
    %91 = vector.extract_strided_slice %76 {offsets = [0, 384], sizes = [8, 128], strides = [1, 1]} : vector<8x512xf32> to vector<8x128xf32>
    %92 = arith.negf %91 : vector<8x128xf32>
    %93 = math.exp %92 : vector<8x128xf32>
    %cst_31 = arith.constant 1.000000e+00 : f32
    %94 = vector.broadcast %cst_31 : f32 to vector<8x128xf32>
    %95 = arith.addf %94, %93 : vector<8x128xf32>
    %96 = arith.divf %94, %95 : vector<8x128xf32>
    %97 = arith.mulf %88, %68 : vector<8x128xf32>
    %98 = arith.mulf %82, %90 : vector<8x128xf32>
    %99 = arith.addf %97, %98 : vector<8x128xf32>
    %100 = math.tanh %99 : vector<8x128xf32>
    %101 = arith.mulf %96, %100 : vector<8x128xf32>
    %c3_i32 = arith.constant 3 : i32
    %c8_i32_32 = arith.constant 8 : i32
    %102 = arith.muli %c3_i32, %c8_i32_32 : i32
    %103 = arith.index_cast %102 : i32 to index
    %c0_33 = arith.constant 0 : index
    %104 = vector.load %arg7[%103, %c0_33] : memref<64x512xf32, #tpu.memory_space<vmem>>, vector<8x512xf32>
    %c0_34 = arith.constant 0 : index
    %c0_35 = arith.constant 0 : index
    %105 = vector.load %arg2[%c0_34, %c0_35] : memref<128x512xf32, #tpu.memory_space<vmem>>, vector<128x512xf32>
    %cst_36 = arith.constant dense<0.000000e+00> : vector<8x512xf32>
    %106 = tpu.matmul %101, %105, %cst_36 {dimension_numbers = #tpu.dot_dimension_numbers<[1], [0], [0], [1], [0, 0, 1, 1], [], []>} : vector<8x128xf32>, vector<128x512xf32>, vector<8x512xf32> -> vector<8x512xf32>
    %107 = arith.addf %104, %106 : vector<8x512xf32>
    %108 = vector.extract_strided_slice %107 {offsets = [0, 0], sizes = [8, 128], strides = [1, 1]} : vector<8x512xf32> to vector<8x128xf32>
    %109 = arith.negf %108 : vector<8x128xf32>
    %110 = math.exp %109 : vector<8x128xf32>
    %cst_37 = arith.constant 1.000000e+00 : f32
    %111 = vector.broadcast %cst_37 : f32 to vector<8x128xf32>
    %112 = arith.addf %111, %110 : vector<8x128xf32>
    %113 = arith.divf %111, %112 : vector<8x128xf32>
    %114 = vector.extract_strided_slice %107 {offsets = [0, 128], sizes = [8, 128], strides = [1, 1]} : vector<8x512xf32> to vector<8x128xf32>
    %115 = arith.negf %114 : vector<8x128xf32>
    %116 = math.exp %115 : vector<8x128xf32>
    %cst_38 = arith.constant 1.000000e+00 : f32
    %117 = vector.broadcast %cst_38 : f32 to vector<8x128xf32>
    %118 = arith.addf %117, %116 : vector<8x128xf32>
    %119 = arith.divf %117, %118 : vector<8x128xf32>
    %120 = vector.extract_strided_slice %107 {offsets = [0, 256], sizes = [8, 128], strides = [1, 1]} : vector<8x512xf32> to vector<8x128xf32>
    %121 = math.tanh %120 : vector<8x128xf32>
    %122 = vector.extract_strided_slice %107 {offsets = [0, 384], sizes = [8, 128], strides = [1, 1]} : vector<8x512xf32> to vector<8x128xf32>
    %123 = arith.negf %122 : vector<8x128xf32>
    %124 = math.exp %123 : vector<8x128xf32>
    %cst_39 = arith.constant 1.000000e+00 : f32
    %125 = vector.broadcast %cst_39 : f32 to vector<8x128xf32>
    %126 = arith.addf %125, %124 : vector<8x128xf32>
    %127 = arith.divf %125, %126 : vector<8x128xf32>
    %128 = arith.mulf %119, %99 : vector<8x128xf32>
    %129 = arith.mulf %113, %121 : vector<8x128xf32>
    %130 = arith.addf %128, %129 : vector<8x128xf32>
    %131 = math.tanh %130 : vector<8x128xf32>
    %132 = arith.mulf %127, %131 : vector<8x128xf32>
    %c4_i32 = arith.constant 4 : i32
    %c8_i32_40 = arith.constant 8 : i32
    %133 = arith.muli %c4_i32, %c8_i32_40 : i32
    %134 = arith.index_cast %133 : i32 to index
    %c0_41 = arith.constant 0 : index
    %135 = vector.load %arg7[%134, %c0_41] : memref<64x512xf32, #tpu.memory_space<vmem>>, vector<8x512xf32>
    %c0_42 = arith.constant 0 : index
    %c0_43 = arith.constant 0 : index
    %136 = vector.load %arg2[%c0_42, %c0_43] : memref<128x512xf32, #tpu.memory_space<vmem>>, vector<128x512xf32>
    %cst_44 = arith.constant dense<0.000000e+00> : vector<8x512xf32>
    %137 = tpu.matmul %132, %136, %cst_44 {dimension_numbers = #tpu.dot_dimension_numbers<[1], [0], [0], [1], [0, 0, 1, 1], [], []>} : vector<8x128xf32>, vector<128x512xf32>, vector<8x512xf32> -> vector<8x512xf32>
    %138 = arith.addf %135, %137 : vector<8x512xf32>
    %139 = vector.extract_strided_slice %138 {offsets = [0, 0], sizes = [8, 128], strides = [1, 1]} : vector<8x512xf32> to vector<8x128xf32>
    %140 = arith.negf %139 : vector<8x128xf32>
    %141 = math.exp %140 : vector<8x128xf32>
    %cst_45 = arith.constant 1.000000e+00 : f32
    %142 = vector.broadcast %cst_45 : f32 to vector<8x128xf32>
    %143 = arith.addf %142, %141 : vector<8x128xf32>
    %144 = arith.divf %142, %143 : vector<8x128xf32>
    %145 = vector.extract_strided_slice %138 {offsets = [0, 128], sizes = [8, 128], strides = [1, 1]} : vector<8x512xf32> to vector<8x128xf32>
    %146 = arith.negf %145 : vector<8x128xf32>
    %147 = math.exp %146 : vector<8x128xf32>
    %cst_46 = arith.constant 1.000000e+00 : f32
    %148 = vector.broadcast %cst_46 : f32 to vector<8x128xf32>
    %149 = arith.addf %148, %147 : vector<8x128xf32>
    %150 = arith.divf %148, %149 : vector<8x128xf32>
    %151 = vector.extract_strided_slice %138 {offsets = [0, 256], sizes = [8, 128], strides = [1, 1]} : vector<8x512xf32> to vector<8x128xf32>
    %152 = math.tanh %151 : vector<8x128xf32>
    %153 = vector.extract_strided_slice %138 {offsets = [0, 384], sizes = [8, 128], strides = [1, 1]} : vector<8x512xf32> to vector<8x128xf32>
    %154 = arith.negf %153 : vector<8x128xf32>
    %155 = math.exp %154 : vector<8x128xf32>
    %cst_47 = arith.constant 1.000000e+00 : f32
    %156 = vector.broadcast %cst_47 : f32 to vector<8x128xf32>
    %157 = arith.addf %156, %155 : vector<8x128xf32>
    %158 = arith.divf %156, %157 : vector<8x128xf32>
    %159 = arith.mulf %150, %130 : vector<8x128xf32>
    %160 = arith.mulf %144, %152 : vector<8x128xf32>
    %161 = arith.addf %159, %160 : vector<8x128xf32>
    %162 = math.tanh %161 : vector<8x128xf32>
    %163 = arith.mulf %158, %162 : vector<8x128xf32>
    %c5_i32 = arith.constant 5 : i32
    %c8_i32_48 = arith.constant 8 : i32
    %164 = arith.muli %c5_i32, %c8_i32_48 : i32
    %165 = arith.index_cast %164 : i32 to index
    %c0_49 = arith.constant 0 : index
    %166 = vector.load %arg7[%165, %c0_49] : memref<64x512xf32, #tpu.memory_space<vmem>>, vector<8x512xf32>
    %c0_50 = arith.constant 0 : index
    %c0_51 = arith.constant 0 : index
    %167 = vector.load %arg2[%c0_50, %c0_51] : memref<128x512xf32, #tpu.memory_space<vmem>>, vector<128x512xf32>
    %cst_52 = arith.constant dense<0.000000e+00> : vector<8x512xf32>
    %168 = tpu.matmul %163, %167, %cst_52 {dimension_numbers = #tpu.dot_dimension_numbers<[1], [0], [0], [1], [0, 0, 1, 1], [], []>} : vector<8x128xf32>, vector<128x512xf32>, vector<8x512xf32> -> vector<8x512xf32>
    %169 = arith.addf %166, %168 : vector<8x512xf32>
    %170 = vector.extract_strided_slice %169 {offsets = [0, 0], sizes = [8, 128], strides = [1, 1]} : vector<8x512xf32> to vector<8x128xf32>
    %171 = arith.negf %170 : vector<8x128xf32>
    %172 = math.exp %171 : vector<8x128xf32>
    %cst_53 = arith.constant 1.000000e+00 : f32
    %173 = vector.broadcast %cst_53 : f32 to vector<8x128xf32>
    %174 = arith.addf %173, %172 : vector<8x128xf32>
    %175 = arith.divf %173, %174 : vector<8x128xf32>
    %176 = vector.extract_strided_slice %169 {offsets = [0, 128], sizes = [8, 128], strides = [1, 1]} : vector<8x512xf32> to vector<8x128xf32>
    %177 = arith.negf %176 : vector<8x128xf32>
    %178 = math.exp %177 : vector<8x128xf32>
    %cst_54 = arith.constant 1.000000e+00 : f32
    %179 = vector.broadcast %cst_54 : f32 to vector<8x128xf32>
    %180 = arith.addf %179, %178 : vector<8x128xf32>
    %181 = arith.divf %179, %180 : vector<8x128xf32>
    %182 = vector.extract_strided_slice %169 {offsets = [0, 256], sizes = [8, 128], strides = [1, 1]} : vector<8x512xf32> to vector<8x128xf32>
    %183 = math.tanh %182 : vector<8x128xf32>
    %184 = vector.extract_strided_slice %169 {offsets = [0, 384], sizes = [8, 128], strides = [1, 1]} : vector<8x512xf32> to vector<8x128xf32>
    %185 = arith.negf %184 : vector<8x128xf32>
    %186 = math.exp %185 : vector<8x128xf32>
    %cst_55 = arith.constant 1.000000e+00 : f32
    %187 = vector.broadcast %cst_55 : f32 to vector<8x128xf32>
    %188 = arith.addf %187, %186 : vector<8x128xf32>
    %189 = arith.divf %187, %188 : vector<8x128xf32>
    %190 = arith.mulf %181, %161 : vector<8x128xf32>
    %191 = arith.mulf %175, %183 : vector<8x128xf32>
    %192 = arith.addf %190, %191 : vector<8x128xf32>
    %193 = math.tanh %192 : vector<8x128xf32>
    %194 = arith.mulf %189, %193 : vector<8x128xf32>
    %c6_i32 = arith.constant 6 : i32
    %c8_i32_56 = arith.constant 8 : i32
    %195 = arith.muli %c6_i32, %c8_i32_56 : i32
    %196 = arith.index_cast %195 : i32 to index
    %c0_57 = arith.constant 0 : index
    %197 = vector.load %arg7[%196, %c0_57] : memref<64x512xf32, #tpu.memory_space<vmem>>, vector<8x512xf32>
    %c0_58 = arith.constant 0 : index
    %c0_59 = arith.constant 0 : index
    %198 = vector.load %arg2[%c0_58, %c0_59] : memref<128x512xf32, #tpu.memory_space<vmem>>, vector<128x512xf32>
    %cst_60 = arith.constant dense<0.000000e+00> : vector<8x512xf32>
    %199 = tpu.matmul %194, %198, %cst_60 {dimension_numbers = #tpu.dot_dimension_numbers<[1], [0], [0], [1], [0, 0, 1, 1], [], []>} : vector<8x128xf32>, vector<128x512xf32>, vector<8x512xf32> -> vector<8x512xf32>
    %200 = arith.addf %197, %199 : vector<8x512xf32>
    %201 = vector.extract_strided_slice %200 {offsets = [0, 0], sizes = [8, 128], strides = [1, 1]} : vector<8x512xf32> to vector<8x128xf32>
    %202 = arith.negf %201 : vector<8x128xf32>
    %203 = math.exp %202 : vector<8x128xf32>
    %cst_61 = arith.constant 1.000000e+00 : f32
    %204 = vector.broadcast %cst_61 : f32 to vector<8x128xf32>
    %205 = arith.addf %204, %203 : vector<8x128xf32>
    %206 = arith.divf %204, %205 : vector<8x128xf32>
    %207 = vector.extract_strided_slice %200 {offsets = [0, 128], sizes = [8, 128], strides = [1, 1]} : vector<8x512xf32> to vector<8x128xf32>
    %208 = arith.negf %207 : vector<8x128xf32>
    %209 = math.exp %208 : vector<8x128xf32>
    %cst_62 = arith.constant 1.000000e+00 : f32
    %210 = vector.broadcast %cst_62 : f32 to vector<8x128xf32>
    %211 = arith.addf %210, %209 : vector<8x128xf32>
    %212 = arith.divf %210, %211 : vector<8x128xf32>
    %213 = vector.extract_strided_slice %200 {offsets = [0, 256], sizes = [8, 128], strides = [1, 1]} : vector<8x512xf32> to vector<8x128xf32>
    %214 = math.tanh %213 : vector<8x128xf32>
    %215 = vector.extract_strided_slice %200 {offsets = [0, 384], sizes = [8, 128], strides = [1, 1]} : vector<8x512xf32> to vector<8x128xf32>
    %216 = arith.negf %215 : vector<8x128xf32>
    %217 = math.exp %216 : vector<8x128xf32>
    %cst_63 = arith.constant 1.000000e+00 : f32
    %218 = vector.broadcast %cst_63 : f32 to vector<8x128xf32>
    %219 = arith.addf %218, %217 : vector<8x128xf32>
    %220 = arith.divf %218, %219 : vector<8x128xf32>
    %221 = arith.mulf %212, %192 : vector<8x128xf32>
    %222 = arith.mulf %206, %214 : vector<8x128xf32>
    %223 = arith.addf %221, %222 : vector<8x128xf32>
    %224 = math.tanh %223 : vector<8x128xf32>
    %225 = arith.mulf %220, %224 : vector<8x128xf32>
    %c7_i32 = arith.constant 7 : i32
    %c8_i32_64 = arith.constant 8 : i32
    %226 = arith.muli %c7_i32, %c8_i32_64 : i32
    %227 = arith.index_cast %226 : i32 to index
    %c0_65 = arith.constant 0 : index
    %228 = vector.load %arg7[%227, %c0_65] : memref<64x512xf32, #tpu.memory_space<vmem>>, vector<8x512xf32>
    %c0_66 = arith.constant 0 : index
    %c0_67 = arith.constant 0 : index
    %229 = vector.load %arg2[%c0_66, %c0_67] : memref<128x512xf32, #tpu.memory_space<vmem>>, vector<128x512xf32>
    %cst_68 = arith.constant dense<0.000000e+00> : vector<8x512xf32>
    %230 = tpu.matmul %225, %229, %cst_68 {dimension_numbers = #tpu.dot_dimension_numbers<[1], [0], [0], [1], [0, 0, 1, 1], [], []>} : vector<8x128xf32>, vector<128x512xf32>, vector<8x512xf32> -> vector<8x512xf32>
    %231 = arith.addf %228, %230 : vector<8x512xf32>
    %232 = vector.extract_strided_slice %231 {offsets = [0, 0], sizes = [8, 128], strides = [1, 1]} : vector<8x512xf32> to vector<8x128xf32>
    %233 = arith.negf %232 : vector<8x128xf32>
    %234 = math.exp %233 : vector<8x128xf32>
    %cst_69 = arith.constant 1.000000e+00 : f32
    %235 = vector.broadcast %cst_69 : f32 to vector<8x128xf32>
    %236 = arith.addf %235, %234 : vector<8x128xf32>
    %237 = arith.divf %235, %236 : vector<8x128xf32>
    %238 = vector.extract_strided_slice %231 {offsets = [0, 128], sizes = [8, 128], strides = [1, 1]} : vector<8x512xf32> to vector<8x128xf32>
    %239 = arith.negf %238 : vector<8x128xf32>
    %240 = math.exp %239 : vector<8x128xf32>
    %cst_70 = arith.constant 1.000000e+00 : f32
    %241 = vector.broadcast %cst_70 : f32 to vector<8x128xf32>
    %242 = arith.addf %241, %240 : vector<8x128xf32>
    %243 = arith.divf %241, %242 : vector<8x128xf32>
    %244 = vector.extract_strided_slice %231 {offsets = [0, 256], sizes = [8, 128], strides = [1, 1]} : vector<8x512xf32> to vector<8x128xf32>
    %245 = math.tanh %244 : vector<8x128xf32>
    %246 = vector.extract_strided_slice %231 {offsets = [0, 384], sizes = [8, 128], strides = [1, 1]} : vector<8x512xf32> to vector<8x128xf32>
    %247 = arith.negf %246 : vector<8x128xf32>
    %248 = math.exp %247 : vector<8x128xf32>
    %cst_71 = arith.constant 1.000000e+00 : f32
    %249 = vector.broadcast %cst_71 : f32 to vector<8x128xf32>
    %250 = arith.addf %249, %248 : vector<8x128xf32>
    %251 = arith.divf %249, %250 : vector<8x128xf32>
    %252 = arith.mulf %243, %223 : vector<8x128xf32>
    %253 = arith.mulf %237, %245 : vector<8x128xf32>
    %254 = arith.addf %252, %253 : vector<8x128xf32>
    %255 = math.tanh %254 : vector<8x128xf32>
    %256 = arith.mulf %251, %255 : vector<8x128xf32>
    %c8_i32_72 = arith.constant 8 : i32
    %c0_73 = arith.constant 0 : index
    %c0_74 = arith.constant 0 : index
    %257 = vector.load %arg4[%c0_73, %c0_74] : memref<128x128xf32, #tpu.memory_space<vmem>>, vector<128x128xf32>
    %cst_75 = arith.constant dense<0.000000e+00> : vector<8x128xf32>
    %258 = tpu.matmul %256, %257, %cst_75 {dimension_numbers = #tpu.dot_dimension_numbers<[1], [0], [0], [1], [0, 0, 1, 1], [], []>} : vector<8x128xf32>, vector<128x128xf32>, vector<8x128xf32> -> vector<8x128xf32>
    %c0_76 = arith.constant 0 : index
    %c0_77 = arith.constant 0 : index
    %259 = vector.load %arg5[%c0_76, %c0_77] : memref<1x128xf32, #tpu.memory_space<vmem>>, vector<1x128xf32>
    %260 = vector.broadcast %259 : vector<1x128xf32> to vector<8x128xf32>
    %261 = arith.addf %258, %260 : vector<8x128xf32>
    %c0_78 = arith.constant 0 : index
    %c0_79 = arith.constant 0 : index
    %262 = vector.load %arg6[%c0_78, %c0_79] : memref<8x128xf32, #tpu.memory_space<vmem>>, vector<8x128xf32>
    tpu.vector_store %arg6[%c0_78, %c0_79], %261 {strides = array<i32>} : memref<8x128xf32, #tpu.memory_space<vmem>>, vector<8x128xf32>,
    return
  }
}

</mosaic_0001>

<bundles_post_ra>
// kernel: tpu_custom_call.1
= control target key start
LH: loop header
LB: loop body
LE: loop exit
PB: predicated region body
PF: predicated region fallthrough
CT: control target
= control target key end

     0   :  { %11 = vsyncpa [#allocation4], 0  ;;  %s3053_s0 = inlined_call_operand.hbm [shape: f32[64,128], index: 0, kind: input, shape index: {}]   ;;  %s3054_s1 = inlined_call_operand.hbm [shape: f32[128,512], index: 1, kind: input, shape index: {}]   ;;  %s3055_s2 = inlined_call_operand.hbm [shape: f32[128,512], index: 2, kind: input, shape index: {}]   ;;  %s3056_s3 = inlined_call_operand.hbm [shape: f32[1,512], index: 3, kind: input, shape index: {}]   ;;  %s3057_s4 = inlined_call_operand.hbm [shape: f32[128,128], index: 4, kind: input, shape index: {}]   ;;  %s3058_s5 = inlined_call_operand.vmem [shape: f32[1,128], index: 5, kind: input, shape index: {}]   ;;  %s3059_s6 = inlined_call_operand.hbm [shape: f32[8,128], index: 6, kind: output, shape index: {}]  }
   0x1   :  { %12 = vsyncpa [#allocation7], 0 }
   0x2   :  { %13 = vsyncpa [#allocation10], 0  ;;  %s32_s23 = sshll.u32 %s3054_s1, 4  ;;  %s33_s23 = int_to_ptr.hbm [resolvable:$true] %s32_s23 }
   0x3   :  { %14 = vsyncpa [#allocation5], 0  ;;  %s2090_s24 = smov [#allocation6]   ;;  %s59_s28 = sshll.u32 %s3056_s3, 4  ;;  %s60_s28 = int_to_ptr.hbm [resolvable:$true] %s59_s28 }
   0x4   :  { %s34_s25 = sshll.u32 %s2090_s24, 4  ;;  %s2091_s29 = smov 512   ;;  %s35_s25 = int_to_ptr.vmem [resolvable:$true] %s34_s25 }
   0x5   :  { %s2092_s30 = smov 32   ;;  %s2093_s7 = smov [#allocation9]  }
   0x6   :  { %40 = dma.hbm_to_vmem [thread:$0]  %s33_s23, 8192, %s35_s25, [#allocation7], %s2091_s29, %s2091_s29, %s2092_s30  }
   0x7   :  { %s61_s8 = sshll.u32 %s2093_s7, 4  ;;  %s19_s11 = sshll.u32 %s3053_s0, 4  ;;  %s62_s8 = int_to_ptr.vmem [resolvable:$true] %s61_s8  ;;  %s20_s11 = int_to_ptr.hbm [resolvable:$true] %s19_s11 }
   0x8   :  { %64 = dma.hbm_to_vmem [thread:$0]  %s60_s28, 64, %s62_s8, [#allocation10]  }
   0x9   :  { %s2094_s1 = smov [#allocation3]   ;;  %s45_s3 = sshll.u32 %s3055_s2, 4  ;;  %s46_s3 = int_to_ptr.hbm [resolvable:$true] %s45_s3 }
   0xa   :  { %s21_s12 = sshll.u32 %s2094_s1, 4  ;;  %s2095_s15 = smov 128   ;;  %s22_s12 = int_to_ptr.vmem [resolvable:$true] %s21_s12 }
   0xb   :  { %s2096_s16 = smov 8   ;;  %s2097_s17 = smov [#allocation8]  }
   0xc   :  { %27 = dma.hbm_to_vmem [thread:$0]  %s20_s11, 1024, %s22_s12, [#allocation4], %s2095_s15, %s2095_s15, %s2096_s16  }
   0xd   :  { %s47_s18 = sshll.u32 %s2097_s17, 4  ;;  %s69_s0 = sshll.u32 %s3057_s4, 4  ;;  %s48_s18 = int_to_ptr.vmem [resolvable:$true] %s47_s18  ;;  %s70_s0 = int_to_ptr.hbm [resolvable:$true] %s69_s0 }
   0xe   :  { %53 = dma.hbm_to_vmem [thread:$0]  %s46_s3, 8192, %s48_s18, [#allocation7], %s2091_s29, %s2091_s29, %s2092_s30  }
   0xf   :  { %s2098_s21 = smov [#allocation11]  }
  0x10   :  { %s71_s22 = sshll.u32 %s2098_s21, 4  ;;  %s72_s22 = int_to_ptr.vmem [resolvable:$true] %s71_s22 }
  0x11   :  { %77 = dma.hbm_to_vmem [thread:$0]  %s70_s0, 2048, %s72_s22, [#allocation10], %s2095_s15, %s2095_s15, %s2096_s16  }
  0x12   :  { %2082 = dma.done.wait [#allocation4], 1024  }
  0x13   :  { %2083 = vsyncadd [#allocation4], 4294966272 }
  0x14   :  { %2084 = dma.done.wait [#allocation7], 16384  }
  0x15   :  { %2085 = vsyncadd [#allocation7], 4294950912 }
  0x16   :  { %2086 = dma.done.wait [#allocation10], 2112  }
  0x17   :  { %2087 = vsyncadd [#allocation10], 4294965184  ;;  %v168_v0 = vld [vmem:[#allocation6 + $0x1e0] sm:$0xff]  ;;  %v169_v1 = vld [vmem:[#allocation6 + $0x1e8] sm:$0xff]  ;;  %s2100_s23 = smov [#allocation12]   ;;  %s1698_s27 = sshll.u32 %s3059_s6, 4  ;;  %s1699_s27 = int_to_ptr.hbm [resolvable:$true] %s1698_s27 }
  0x18   :  { %v170_v2 = vld [vmem:[#allocation6 + $0x1f0] sm:$0xff]  ;;  %182 = vmatpush.msra.mxu0 %v168_v0  ;;  %223 = vmatpush.msra.mxu1 %v169_v1  ;;  %v171_v3 = vld [vmem:[#allocation6 + $0x1f8] sm:$0xff]  ;;  %v164_v4 = vld [vmem:[#allocation6 + $0x1c0] sm:$0xff]  ;;  %s1696_s24 = sshll.u32 %s2100_s23, 4  ;;  %s1697_s24 = int_to_ptr.vmem [resolvable:$true] %s1696_s24 }
  0x19   :  { %v165_v5 = vld [vmem:[#allocation6 + $0x1c8] sm:$0xff]  ;;  %264 = vmatpush.msra.mxu2 %v170_v2  ;;  %305 = vmatpush.msra.mxu3 %v171_v3  ;;  %v166_v6 = vld [vmem:[#allocation6 + $0x1d0] sm:$0xff]  ;;  %v167_v7 = vld [vmem:[#allocation6 + $0x1d8] sm:$0xff] }
  0x1a   :  { %v160_v8 = vld [vmem:[#allocation6 + $0x1a0] sm:$0xff]  ;;  %183 = vmatpush.msra.mxu0 %v164_v4  ;;  %224 = vmatpush.msra.mxu1 %v165_v5  ;;  %v161_v9 = vld [vmem:[#allocation6 + $0x1a8] sm:$0xff]  ;;  %v162_v10 = vld [vmem:[#allocation6 + $0x1b0] sm:$0xff] }
  0x1b   :  { %v163_v11 = vld [vmem:[#allocation6 + $0x1b8] sm:$0xff]  ;;  %265 = vmatpush.msra.mxu2 %v166_v6  ;;  %306 = vmatpush.msra.mxu3 %v167_v7  ;;  %v156_v12 = vld [vmem:[#allocation6 + $0x180] sm:$0xff]  ;;  %v157_v13 = vld [vmem:[#allocation6 + $0x188] sm:$0xff] }
  0x1c   :  { %184 = vmatpush.msra.mxu0 %v160_v8  ;;  %225 = vmatpush.msra.mxu1 %v161_v9  ;;  %v158_v14 = vld [vmem:[#allocation6 + $0x190] sm:$0xff]  ;;  %v159_v15 = vld [vmem:[#allocation6 + $0x198] sm:$0xff]  ;;  %v152_v16 = vld [vmem:[#allocation6 + $0x160] sm:$0xff] }
  0x1d   :  { %266 = vmatpush.msra.mxu2 %v162_v10  ;;  %307 = vmatpush.msra.mxu3 %v163_v11  ;;  %v153_v17 = vld [vmem:[#allocation6 + $0x168] sm:$0xff]  ;;  %v154_v18 = vld [vmem:[#allocation6 + $0x170] sm:$0xff]  ;;  %v155_v19 = vld [vmem:[#allocation6 + $0x178] sm:$0xff] }
  0x1e   :  { %185 = vmatpush.msra.mxu0 %v156_v12  ;;  %226 = vmatpush.msra.mxu1 %v157_v13  ;;  %v148_v20 = vld [vmem:[#allocation6 + $0x140] sm:$0xff]  ;;  %v149_v21 = vld [vmem:[#allocation6 + $0x148] sm:$0xff]  ;;  %v150_v22 = vld [vmem:[#allocation6 + $0x150] sm:$0xff] }
  0x1f   :  { %267 = vmatpush.msra.mxu2 %v158_v14  ;;  %308 = vmatpush.msra.mxu3 %v159_v15  ;;  %v151_v23 = vld [vmem:[#allocation6 + $0x158] sm:$0xff]  ;;  %v144_v24 = vld [vmem:[#allocation6 + $0x120] sm:$0xff]  ;;  %v145_v25 = vld [vmem:[#allocation6 + $0x128] sm:$0xff] }
  0x20   :  { %186 = vmatpush.msra.mxu0 %v152_v16  ;;  %227 = vmatpush.msra.mxu1 %v153_v17  ;;  %v146_v26 = vld [vmem:[#allocation6 + $0x130] sm:$0xff]  ;;  %v147_v27 = vld [vmem:[#allocation6 + $0x138] sm:$0xff]  ;;  %v140_v28 = vld [vmem:[#allocation6 + $0x100] sm:$0xff] }
  0x21   :  { %268 = vmatpush.msra.mxu2 %v154_v18  ;;  %309 = vmatpush.msra.mxu3 %v155_v19  ;;  %v141_v29 = vld [vmem:[#allocation6 + $0x108] sm:$0xff]  ;;  %v142_v30 = vld [vmem:[#allocation6 + $0x110] sm:$0xff]  ;;  %v143_v31 = vld [vmem:[#allocation6 + $0x118] sm:$0xff] }
  0x22   :  { %187 = vmatpush.msra.mxu0 %v148_v20  ;;  %228 = vmatpush.msra.mxu1 %v149_v21  ;;  %v136_v32 = vld [vmem:[#allocation6 + $0xe0] sm:$0xff]  ;;  %v137_v33 = vld [vmem:[#allocation6 + $0xe8] sm:$0xff]  ;;  %v138_v34 = vld [vmem:[#allocation6 + $0xf0] sm:$0xff] }
  0x23   :  { %269 = vmatpush.msra.mxu2 %v150_v22  ;;  %310 = vmatpush.msra.mxu3 %v151_v23  ;;  %v139_v35 = vld [vmem:[#allocation6 + $0xf8] sm:$0xff]  ;;  %v132_v36 = vld [vmem:[#allocation6 + $0xc0] sm:$0xff]  ;;  %v133_v37 = vld [vmem:[#allocation6 + $0xc8] sm:$0xff] }
  0x24   :  { %188 = vmatpush.msra.mxu0 %v144_v24  ;;  %229 = vmatpush.msra.mxu1 %v145_v25  ;;  %v134_v38 = vld [vmem:[#allocation6 + $0xd0] sm:$0xff]  ;;  %v135_v39 = vld [vmem:[#allocation6 + $0xd8] sm:$0xff]  ;;  %v128_v40 = vld [vmem:[#allocation6 + $0xa0] sm:$0xff] }
  0x25   :  { %270 = vmatpush.msra.mxu2 %v146_v26  ;;  %311 = vmatpush.msra.mxu3 %v147_v27  ;;  %v129_v41 = vld [vmem:[#allocation6 + $0xa8] sm:$0xff]  ;;  %v130_v42 = vld [vmem:[#allocation6 + $0xb0] sm:$0xff]  ;;  %v131_v43 = vld [vmem:[#allocation6 + $0xb8] sm:$0xff] }
  0x26   :  { %189 = vmatpush.msra.mxu0 %v140_v28  ;;  %230 = vmatpush.msra.mxu1 %v141_v29  ;;  %v124_v44 = vld [vmem:[#allocation6 + $0x80] sm:$0xff]  ;;  %v125_v45 = vld [vmem:[#allocation6 + $0x88] sm:$0xff]  ;;  %v126_v46 = vld [vmem:[#allocation6 + $0x90] sm:$0xff] }
  0x27   :  { %271 = vmatpush.msra.mxu2 %v142_v30  ;;  %312 = vmatpush.msra.mxu3 %v143_v31  ;;  %v127_v47 = vld [vmem:[#allocation6 + $0x98] sm:$0xff]  ;;  %v120_v48 = vld [vmem:[#allocation6 + $0x60] sm:$0xff]  ;;  %v121_v49 = vld [vmem:[#allocation6 + $0x68] sm:$0xff] }
  0x28   :  { %190 = vmatpush.msra.mxu0 %v136_v32  ;;  %231 = vmatpush.msra.mxu1 %v137_v33  ;;  %v122_v50 = vld [vmem:[#allocation6 + $0x70] sm:$0xff]  ;;  %v123_v51 = vld [vmem:[#allocation6 + $0x78] sm:$0xff]  ;;  %v116_v52 = vld [vmem:[#allocation6 + $0x40] sm:$0xff] }
  0x29   :  { %272 = vmatpush.msra.mxu2 %v138_v34  ;;  %313 = vmatpush.msra.mxu3 %v139_v35  ;;  %v117_v53 = vld [vmem:[#allocation6 + $0x48] sm:$0xff]  ;;  %v118_v54 = vld [vmem:[#allocation6 + $0x50] sm:$0xff]  ;;  %v119_v55 = vld [vmem:[#allocation6 + $0x58] sm:$0xff] }
  0x2a   :  { %191 = vmatpush.msra.mxu0 %v132_v36  ;;  %232 = vmatpush.msra.mxu1 %v133_v37  ;;  %v112_v56 = vld [vmem:[#allocation6 + $0x20] sm:$0xff]  ;;  %v113_v57 = vld [vmem:[#allocation6 + $0x28] sm:$0xff]  ;;  %v114_v58 = vld [vmem:[#allocation6 + $0x30] sm:$0xff] }
  0x2b   :  { %273 = vmatpush.msra.mxu2 %v134_v38  ;;  %314 = vmatpush.msra.mxu3 %v135_v39  ;;  %v115_v59 = vld [vmem:[#allocation6 + $0x38] sm:$0xff]  ;;  %v108_v60 = vld [vmem:[#allocation6] sm:$0xff]  ;;  %v109_v61 = vld [vmem:[#allocation6 + $0x8] sm:$0xff] }
  0x2c   :  { %192 = vmatpush.msra.mxu0 %v128_v40  ;;  %233 = vmatpush.msra.mxu1 %v129_v41  ;;  %v110_v62 = vld [vmem:[#allocation6 + $0x10] sm:$0xff]  ;;  %v111_v63 = vld [vmem:[#allocation6 + $0x18] sm:$0xff]  ;;  %v100_v0 = vld [vmem:[#allocation3] sm:$0xff] }
  0x2d   :  { %274 = vmatpush.msra.mxu2 %v130_v42  ;;  %315 = vmatpush.msra.mxu3 %v131_v43  ;;  %v2151_v1 = vld [vmem:[#allocation8 + $0x1e0] sm:$0xff]  ;;  %v2153_v2 = vld [vmem:[#allocation8 + $0x1e8] sm:$0xff]  ;;  %v2155_v3 = vld [vmem:[#allocation8 + $0x1f8] sm:$0xff] }
  0x2e   :  { %193 = vmatpush.msra.mxu0 %v124_v44  ;;  %234 = vmatpush.msra.mxu1 %v125_v45  ;;  %v2157_v4 = vld [vmem:[#allocation8 + $0x1f0] sm:$0xff]  ;;  %v2159_v5 = vld [vmem:[#allocation8 + $0x1c0] sm:$0xff]  ;;  %v2161_v6 = vld [vmem:[#allocation8 + $0x1c8] sm:$0xff] }
  0x2f   :  { %275 = vmatpush.msra.mxu2 %v126_v46  ;;  %316 = vmatpush.msra.mxu3 %v127_v47  ;;  %v2165_v7 = vld [vmem:[#allocation8 + $0x1d8] sm:$0xff]  ;;  %v2167_v8 = vld [vmem:[#allocation8 + $0x1d0] sm:$0xff]  ;;  %v2170_v9 = vld [vmem:[#allocation8 + $0x1a0] sm:$0xff] }
  0x30   :  { %194 = vmatpush.msra.mxu0 %v120_v48  ;;  %235 = vmatpush.msra.mxu1 %v121_v49  ;;  %v2172_v10 = vld [vmem:[#allocation8 + $0x1a8] sm:$0xff]  ;;  %v2177_v11 = vld [vmem:[#allocation8 + $0x1b8] sm:$0xff]  ;;  %v2179_v12 = vld [vmem:[#allocation8 + $0x1b0] sm:$0xff] }
  0x31   :  { %276 = vmatpush.msra.mxu2 %v122_v50  ;;  %317 = vmatpush.msra.mxu3 %v123_v51  ;;  %v101_v13 = vld [vmem:[#allocation3 + $0x8] sm:$0xff]  ;;  %v2185_v14 = vld [vmem:[#allocation8 + $0x180] sm:$0xff]  ;;  %v2191_v16 = vld [vmem:[#allocation8 + $0x198] sm:$0xff] }
  0x32   :  { %195 = vmatpush.msra.mxu0 %v116_v52  ;;  %236 = vmatpush.msra.mxu1 %v117_v53  ;;  %v2187_v15 = vld [vmem:[#allocation8 + $0x188] sm:$0xff]  ;;  %v2193_v17 = vld [vmem:[#allocation8 + $0x190] sm:$0xff]  ;;  %v2195_v18 = vld [vmem:[#allocation8 + $0x160] sm:$0xff] }
  0x33   :  { %277 = vmatpush.msra.mxu2 %v118_v54  ;;  %318 = vmatpush.msra.mxu3 %v119_v55  ;;  %v2197_v19 = vld [vmem:[#allocation8 + $0x168] sm:$0xff]  ;;  %v2201_v20 = vld [vmem:[#allocation8 + $0x178] sm:$0xff]  ;;  %v2203_v21 = vld [vmem:[#allocation8 + $0x170] sm:$0xff] }
  0x34   :  { %196 = vmatpush.msra.mxu0 %v112_v56  ;;  %237 = vmatpush.msra.mxu1 %v113_v57  ;;  %v2206_v22 = vld [vmem:[#allocation8 + $0x140] sm:$0xff]  ;;  %v2208_v23 = vld [vmem:[#allocation8 + $0x148] sm:$0xff]  ;;  %v2213_v24 = vld [vmem:[#allocation8 + $0x158] sm:$0xff] }
  0x35   :  { %278 = vmatpush.msra.mxu2 %v114_v58  ;;  %319 = vmatpush.msra.mxu3 %v115_v59  ;;  %v2215_v25 = vld [vmem:[#allocation8 + $0x150] sm:$0xff]  ;;  %v2221_v27 = vld [vmem:[#allocation8 + $0x120] sm:$0xff]  ;;  %v2223_v28 = vld [vmem:[#allocation8 + $0x128] sm:$0xff] }
  0x36   :  { %197 = vmatpush.msra.mxu0 %v108_v60  ;;  %238 = vmatpush.msra.mxu1 %v109_v61  ;;  %v102_v26 = vld [vmem:[#allocation3 + $0x10] sm:$0xff]  ;;  %v2227_v29 = vld [vmem:[#allocation8 + $0x138] sm:$0xff]  ;;  %v2231_v31 = vld [vmem:[#allocation8 + $0x100] sm:$0xff] }
  0x37   :  { %279 = vmatpush.msra.mxu2 %v110_v62  ;;  %320 = vmatpush.msra.mxu3 %v111_v63  ;;  %v2229_v30 = vld [vmem:[#allocation8 + $0x130] sm:$0xff]  ;;  %v2233_v32 = vld [vmem:[#allocation8 + $0x108] sm:$0xff]  ;;  %v2237_v33 = vld [vmem:[#allocation8 + $0x118] sm:$0xff] }
  0x38   :  { %198 = vmatmul.f32.vlgmr.msra.gmra.mxu0 %v100_v0  ;;  %239 = vmatmul.f32.vlgmr.msra.gmra.mxu1 %v100_v0  ;;  %v2239_v34 = vld [vmem:[#allocation8 + $0x110] sm:$0xff]  ;;  %v2242_v35 = vld [vmem:[#allocation8 + $0xe0] sm:$0xff]  ;;  %v2244_v36 = vld [vmem:[#allocation8 + $0xe8] sm:$0xff] }
  0x39   :  { %280 = vmatmul.f32.vlgmr.msra.gmra.mxu2 %v100_v0  ;;  %321 = vmatmul.f32.vlgmr.msra.gmra.mxu3 %v100_v0  ;;  %v2249_v37 = vld [vmem:[#allocation8 + $0xf8] sm:$0xff]  ;;  %v2251_v38 = vld [vmem:[#allocation8 + $0xf0] sm:$0xff]  ;;  %v2257_v40 = vld [vmem:[#allocation8 + $0xc0] sm:$0xff] }
  0x3a   :  { %446 = vmatpush.msrb.mxu0 %v2151_v1  ;;  %466 = vmatpush.msrb.mxu1 %v2153_v2  ;;  %v103_v39 = vld [vmem:[#allocation3 + $0x18] sm:$0xff]  ;;  %v2259_v41 = vld [vmem:[#allocation8 + $0xc8] sm:$0xff]  ;;  %v2265_v43 = vld [vmem:[#allocation8 + $0xd0] sm:$0xff] }
  0x3b   :  { %506 = vmatpush.msrb.mxu3 %v2155_v3  ;;  %486 = vmatpush.msrb.mxu2 %v2157_v4  ;;  %v2263_v42 = vld [vmem:[#allocation8 + $0xd8] sm:$0xff]  ;;  %3148 = vst [vmem:[#allocation18_spill] sm:$0xff] %v2265_v43  ;;  %v2267_v44 = vld [vmem:[#allocation8 + $0xa0] sm:$0xff]  ;;  %v2269_v45 = vld [vmem:[#allocation8 + $0xa8] sm:$0xff] }
  0x3c   :  { %447 = vmatpush.msrb.mxu0 %v2159_v5  ;;  %467 = vmatpush.msrb.mxu1 %v2161_v6  ;;  %3147 = vst [vmem:[#allocation17_spill] sm:$0xff] %v2263_v42  ;;  %v2273_v46 = vld [vmem:[#allocation8 + $0xb8] sm:$0xff]  ;;  %v2275_v47 = vld [vmem:[#allocation8 + $0xb0] sm:$0xff]  ;;  %v2278_v48 = vld [vmem:[#allocation8 + $0x80] sm:$0xff] }
  0x3d   :  { %507 = vmatpush.msrb.mxu3 %v2165_v7  ;;  %487 = vmatpush.msrb.mxu2 %v2167_v8  ;;  %3149 = vst [vmem:[#allocation19_spill] sm:$0xff] %v2267_v44  ;;  %v2280_v49 = vld [vmem:[#allocation8 + $0x88] sm:$0xff]  ;;  %v2285_v50 = vld [vmem:[#allocation8 + $0x98] sm:$0xff]  ;;  %v2287_v51 = vld [vmem:[#allocation8 + $0x90] sm:$0xff] }
  0x3e   :  { %448 = vmatpush.msrb.mxu0 %v2170_v9  ;;  %468 = vmatpush.msrb.mxu1 %v2172_v10  ;;  %3150 = vst [vmem:[#allocation20_spill] sm:$0xff] %v2269_v45  ;;  %v104_v52 = vld [vmem:[#allocation3 + $0x20] sm:$0xff]  ;;  %v2295_v54 = vld [vmem:[#allocation8 + $0x68] sm:$0xff]  ;;  %v2299_v55 = vld [vmem:[#allocation8 + $0x78] sm:$0xff] }
  0x3f   :  { %508 = vmatpush.msrb.mxu3 %v2177_v11  ;;  %488 = vmatpush.msrb.mxu2 %v2179_v12  ;;  %3151 = vst [vmem:[#allocation21_spill] sm:$0xff] %v2273_v46  ;;  %v2293_v53 = vld [vmem:[#allocation8 + $0x60] sm:$0xff]  ;;  %v2301_v56 = vld [vmem:[#allocation8 + $0x70] sm:$0xff]  ;;  %v2305_v58 = vld [vmem:[#allocation8 + $0x48] sm:$0xff] }
  0x40   :  { %201 = vmatmul.f32.gmra.mxu0 %v101_v13  ;;  %242 = vmatmul.f32.gmra.mxu1 %v101_v13  ;;  %3152 = vst [vmem:[#allocation22_spill] sm:$0xff] %v2275_v47  ;;  %v2303_v57 = vld [vmem:[#allocation8 + $0x40] sm:$0xff]  ;;  %v2309_v59 = vld [vmem:[#allocation8 + $0x58] sm:$0xff]  ;;  %v2311_v60 = vld [vmem:[#allocation8 + $0x50] sm:$0xff] }
  0x41   :  { %283 = vmatmul.f32.gmra.mxu2 %v101_v13  ;;  %324 = vmatmul.f32.gmra.mxu3 %v101_v13  ;;  %3153 = vst [vmem:[#allocation23_spill] sm:$0xff] %v2278_v48  ;;  %v2314_v61 = vld [vmem:[#allocation8 + $0x20] sm:$0xff]  ;;  %v2316_v62 = vld [vmem:[#allocation8 + $0x28] sm:$0xff]  ;;  %v2321_v63 = vld [vmem:[#allocation8 + $0x30] sm:$0xff] }
  0x42   :  { %449 = vmatpush.msrb.mxu0 %v2185_v14  ;;  %469 = vmatpush.msrb.mxu1 %v2187_v15  ;;  %3154 = vst [vmem:[#allocation24_spill] sm:$0xff] %v2280_v49  ;;  %v2323_v0 = vld [vmem:[#allocation8 + $0x38] sm:$0xff]  ;;  %v105_v13 = vld [vmem:[#allocation3 + $0x28] sm:$0xff] }
  0x43   :  { %509 = vmatpush.msrb.mxu3 %v2191_v16  ;;  %489 = vmatpush.msrb.mxu2 %v2193_v17  ;;  %3155 = vst [vmem:[#allocation25_spill] sm:$0xff] %v2285_v50 }
  0x44   :  { %450 = vmatpush.msrb.mxu0 %v2195_v18  ;;  %470 = vmatpush.msrb.mxu1 %v2197_v19  ;;  %3156 = vst [vmem:[#allocation26_spill] sm:$0xff] %v2287_v51 }
  0x45   :  { %510 = vmatpush.msrb.mxu3 %v2201_v20  ;;  %490 = vmatpush.msrb.mxu2 %v2203_v21  ;;  %3157 = vst [vmem:[#allocation27_spill] sm:$0xff] %v2293_v53 }
  0x46   :  { %451 = vmatpush.msrb.mxu0 %v2206_v22  ;;  %471 = vmatpush.msrb.mxu1 %v2208_v23  ;;  %3158 = vst [vmem:[#allocation28_spill] sm:$0xff] %v2295_v54 }
  0x47   :  { %511 = vmatpush.msrb.mxu3 %v2213_v24  ;;  %491 = vmatpush.msrb.mxu2 %v2215_v25  ;;  %3159 = vst [vmem:[#allocation29_spill] sm:$0xff] %v2299_v55 }
  0x48   :  { %204 = vmatmul.f32.gmra.mxu0 %v102_v26  ;;  %245 = vmatmul.f32.gmra.mxu1 %v102_v26  ;;  %3160 = vst [vmem:[#allocation30_spill] sm:$0xff] %v2301_v56 }
  0x49   :  { %286 = vmatmul.f32.gmra.mxu2 %v102_v26  ;;  %327 = vmatmul.f32.gmra.mxu3 %v102_v26  ;;  %3161 = vst [vmem:[#allocation31_spill] sm:$0xff] %v2303_v57  ;;  %v2329_v26 = vld [vmem:[#allocation8] sm:$0xff] }
  0x4a   :  { %452 = vmatpush.msrb.mxu0 %v2221_v27  ;;  %472 = vmatpush.msrb.mxu1 %v2223_v28  ;;  %3162 = vst [vmem:[#allocation32_spill] sm:$0xff] %v2305_v58 }
  0x4b   :  { %512 = vmatpush.msrb.mxu3 %v2227_v29  ;;  %492 = vmatpush.msrb.mxu2 %v2229_v30  ;;  %3163 = vst [vmem:[#allocation33_spill] sm:$0xff] %v2309_v59 }
  0x4c   :  { %453 = vmatpush.msrb.mxu0 %v2231_v31  ;;  %473 = vmatpush.msrb.mxu1 %v2233_v32  ;;  %3164 = vst [vmem:[#allocation34_spill] sm:$0xff] %v2311_v60 }
  0x4d   :  { %513 = vmatpush.msrb.mxu3 %v2237_v33  ;;  %493 = vmatpush.msrb.mxu2 %v2239_v34  ;;  %3165 = vst [vmem:[#allocation35_spill] sm:$0xff] %v2314_v61 }
  0x4e   :  { %454 = vmatpush.msrb.mxu0 %v2242_v35  ;;  %474 = vmatpush.msrb.mxu1 %v2244_v36  ;;  %3166 = vst [vmem:[#allocation36_spill] sm:$0xff] %v2316_v62 }
  0x4f   :  { %514 = vmatpush.msrb.mxu3 %v2249_v37  ;;  %494 = vmatpush.msrb.mxu2 %v2251_v38  ;;  %3167 = vst [vmem:[#allocation37_spill] sm:$0xff] %v2321_v63 }
  0x50   :  { %207 = vmatmul.f32.gmra.mxu0 %v103_v39  ;;  %248 = vmatmul.f32.gmra.mxu1 %v103_v39  ;;  %3168 = vst [vmem:[#allocation38_spill] sm:$0xff] %v2323_v0 }
  0x51   :  { %289 = vmatmul.f32.gmra.mxu2 %v103_v39  ;;  %330 = vmatmul.f32.gmra.mxu3 %v103_v39  ;;  %3169 = vst [vmem:[#allocation39_spill] sm:$0xff] %v2329_v26  ;;  %v2331_v39 = vld [vmem:[#allocation8 + $0x8] sm:$0xff] }
  0x52   :  { %455 = vmatpush.msrb.mxu0 %v2257_v40  ;;  %475 = vmatpush.msrb.mxu1 %v2259_v41  ;;  %3170 = vst [vmem:[#allocation40_spill] sm:$0xff] %v2331_v39 }
  0x53   :  { %515 = vmatpush.msrb.mxu3 %v2263_v42  ;;  %495 = vmatpush.msrb.mxu2 %v2265_v43 }
  0x54   :  { %456 = vmatpush.msrb.mxu0 %v2267_v44  ;;  %476 = vmatpush.msrb.mxu1 %v2269_v45 }
  0x55   :  { %516 = vmatpush.msrb.mxu3 %v2273_v46  ;;  %496 = vmatpush.msrb.mxu2 %v2275_v47 }
  0x56   :  { %457 = vmatpush.msrb.mxu0 %v2278_v48  ;;  %477 = vmatpush.msrb.mxu1 %v2280_v49 }
  0x57   :  { %517 = vmatpush.msrb.mxu3 %v2285_v50  ;;  %497 = vmatpush.msrb.mxu2 %v2287_v51 }
  0x58   :  { %210 = vmatmul.f32.gmra.mxu0 %v104_v52  ;;  %251 = vmatmul.f32.gmra.mxu1 %v104_v52 }
  0x59   :  { %292 = vmatmul.f32.gmra.mxu2 %v104_v52  ;;  %333 = vmatmul.f32.gmra.mxu3 %v104_v52  ;;  %v2335_v52 = vld [vmem:[#allocation8 + $0x10] sm:$0xff] }
  0x5a   :  { %458 = vmatpush.msrb.mxu0 %v2293_v53  ;;  %478 = vmatpush.msrb.mxu1 %v2295_v54  ;;  %3171 = vst [vmem:[#allocation41_spill] sm:$0xff] %v2335_v52 }
  0x5b   :  { %518 = vmatpush.msrb.mxu3 %v2299_v55  ;;  %498 = vmatpush.msrb.mxu2 %v2301_v56 }
  0x5c   :  { %459 = vmatpush.msrb.mxu0 %v2303_v57  ;;  %479 = vmatpush.msrb.mxu1 %v2305_v58  ;;  %v2337_v58 = vld [vmem:[#allocation8 + $0x18] sm:$0xff] }
  0x5d   :  { %519 = vmatpush.msrb.mxu3 %v2309_v59  ;;  %499 = vmatpush.msrb.mxu2 %v2311_v60  ;;  %3172 = vst [vmem:[#allocation42_spill] sm:$0xff] %v2337_v58 }
  0x5e   :  { %460 = vmatpush.msrb.mxu0 %v2314_v61  ;;  %480 = vmatpush.msrb.mxu1 %v2316_v62 }
  0x5f   :  { %500 = vmatpush.msrb.mxu2 %v2321_v63  ;;  %520 = vmatpush.msrb.mxu3 %v2323_v0  ;;  %v106_v0 = vld [vmem:[#allocation3 + $0x30] sm:$0xff] }
  0x60   :  { %213 = vmatmul.f32.gmra.mxu0 %v105_v13  ;;  %254 = vmatmul.f32.gmra.mxu1 %v105_v13 }
  0x61   :  { %295 = vmatmul.f32.gmra.mxu2 %v105_v13  ;;  %336 = vmatmul.f32.gmra.mxu3 %v105_v13  ;;  %v107_v13 = vld [vmem:[#allocation3 + $0x38] sm:$0xff] }
  0x62   :  { %461 = vmatpush.msrb.mxu0 %v2329_v26  ;;  %481 = vmatpush.msrb.mxu1 %v2331_v39 }
  0x63   :  { %501 = vmatpush.msrb.mxu2 %v2335_v52  ;;  %521 = vmatpush.msrb.mxu3 %v2337_v58 }
  0x64   :  { %597 = vmatpush.msra.mxu0 %v2151_v1  ;;  %617 = vmatpush.msra.mxu1 %v2153_v2 }
  0x65   :  { %637 = vmatpush.msra.mxu2 %v2157_v4  ;;  %657 = vmatpush.msra.mxu3 %v2155_v3 }
  0x66   :  { %598 = vmatpush.msra.mxu0 %v2159_v5  ;;  %618 = vmatpush.msra.mxu1 %v2161_v6 }
  0x67   :  { %638 = vmatpush.msra.mxu2 %v2167_v8  ;;  %658 = vmatpush.msra.mxu3 %v2165_v7 }
  0x68   :  { %216 = vmatmul.f32.gmra.mxu0 %v106_v0  ;;  %257 = vmatmul.f32.gmra.mxu1 %v106_v0 }
  0x69   :  { %298 = vmatmul.f32.gmra.mxu2 %v106_v0  ;;  %339 = vmatmul.f32.gmra.mxu3 %v106_v0  ;;  %v2099_v0 = vmov 0.0  }
  0x6a   :  { %599 = vmatpush.msra.mxu0 %v2170_v9  ;;  %619 = vmatpush.msra.mxu1 %v2172_v10 }
  0x6b   :  { %639 = vmatpush.msra.mxu2 %v2179_v12  ;;  %659 = vmatpush.msra.mxu3 %v2177_v11 }
  0x6c   :  { %600 = vmatpush.msra.mxu0 %v2185_v14  ;;  %620 = vmatpush.msra.mxu1 %v2187_v15 }
  0x6d   :  { %640 = vmatpush.msra.mxu2 %v2193_v17  ;;  %660 = vmatpush.msra.mxu3 %v2191_v16 }
  0x6e   :  { %601 = vmatpush.msra.mxu0 %v2195_v18  ;;  %621 = vmatpush.msra.mxu1 %v2197_v19 }
  0x6f   :  { %641 = vmatpush.msra.mxu2 %v2203_v21  ;;  %661 = vmatpush.msra.mxu3 %v2201_v20 }
  0x70   :  { %219 = vmatmul.f32.gmra.mxu0 %v107_v13  ;;  %260 = vmatmul.f32.gmra.mxu1 %v107_v13 }
  0x71   :  { %301 = vmatmul.f32.gmra.mxu2 %v107_v13  ;;  %342 = vmatmul.f32.gmra.mxu3 %v107_v13  ;;  %v3173_v13 = vld [vmem:[#allocation32_spill] sm:$0xff] }
  0x72   :  { %602 = vmatpush.msra.mxu0 %v2206_v22  ;;  %622 = vmatpush.msra.mxu1 %v2208_v23 }
  0x73   :  { %642 = vmatpush.msra.mxu2 %v2215_v25  ;;  %662 = vmatpush.msra.mxu3 %v2213_v24 }
  0x74   :  { %603 = vmatpush.msra.mxu0 %v2221_v27  ;;  %623 = vmatpush.msra.mxu1 %v2223_v28 }
  0x75   :  { %643 = vmatpush.msra.mxu2 %v2229_v30  ;;  %663 = vmatpush.msra.mxu3 %v2227_v29 }
  0x76   :  { %604 = vmatpush.msra.mxu0 %v2231_v31  ;;  %624 = vmatpush.msra.mxu1 %v2233_v32 }
  0x77   :  { %644 = vmatpush.msra.mxu2 %v2239_v34  ;;  %664 = vmatpush.msra.mxu3 %v2237_v33 }
  0x78   :  { %462 = vmatmul.f32.vlgmr.msrb.gmra.mxu0 %v2099_v0  ;;  %482 = vmatmul.f32.vlgmr.msrb.gmra.mxu1 %v2099_v0 }
  0x79   :  { %502 = vmatmul.f32.vlgmr.msrb.gmra.mxu2 %v2099_v0  ;;  %522 = vmatmul.f32.vlgmr.msrb.gmra.mxu3 %v2099_v0  ;;  %v3174_v0 = vld [vmem:[#allocation38_spill] sm:$0xff] }
  0x7a   :  { %605 = vmatpush.msra.mxu0 %v2242_v35  ;;  %625 = vmatpush.msra.mxu1 %v2244_v36 }
  0x7b   :  { %645 = vmatpush.msra.mxu2 %v2251_v38  ;;  %665 = vmatpush.msra.mxu3 %v2249_v37 }
  0x7c   :  { %606 = vmatpush.msra.mxu0 %v2257_v40  ;;  %626 = vmatpush.msra.mxu1 %v2259_v41 }
  0x7d   :  { %646 = vmatpush.msra.mxu2 %v2265_v43  ;;  %666 = vmatpush.msra.mxu3 %v2263_v42 }
  0x7e   :  { %607 = vmatpush.msra.mxu0 %v2267_v44  ;;  %627 = vmatpush.msra.mxu1 %v2269_v45 }
  0x7f   :  { %647 = vmatpush.msra.mxu2 %v2275_v47  ;;  %667 = vmatpush.msra.mxu3 %v2273_v46 }
  0x80   :  { %608 = vmatpush.msra.mxu0 %v2278_v48  ;;  %628 = vmatpush.msra.mxu1 %v2280_v49 }
  0x81   :  { %648 = vmatpush.msra.mxu2 %v2287_v51  ;;  %668 = vmatpush.msra.mxu3 %v2285_v50 }
  0x82   :  { %609 = vmatpush.msra.mxu0 %v2293_v53  ;;  %629 = vmatpush.msra.mxu1 %v2295_v54 }
  0x83   :  { %649 = vmatpush.msra.mxu2 %v2301_v56  ;;  %669 = vmatpush.msra.mxu3 %v2299_v55 }
  0x84   :  { %610 = vmatpush.msra.mxu0 %v2303_v57  ;;  %630 = vmatpush.msra.mxu1 %v3173_v13 }
  0x85   :  { %650 = vmatpush.msra.mxu2 %v2311_v60  ;;  %670 = vmatpush.msra.mxu3 %v2309_v59 }
  0x86   :  { %611 = vmatpush.msra.mxu0 %v2314_v61  ;;  %631 = vmatpush.msra.mxu1 %v2316_v62 }
  0x87   :  { %651 = vmatpush.msra.mxu2 %v2321_v63  ;;  %671 = vmatpush.msra.mxu3 %v3174_v0 }
  0x88   :  { %612 = vmatpush.msra.mxu0 %v2329_v26  ;;  %632 = vmatpush.msra.mxu1 %v2331_v39 }
  0x89   :  { %652 = vmatpush.msra.mxu2 %v2335_v52  ;;  %672 = vmatpush.msra.mxu3 %v2337_v58 }
  0x8a   :  { %748 = vmatpush.msrb.mxu0 %v2151_v1  ;;  %768 = vmatpush.msrb.mxu1 %v2153_v2 }
  0x8b   :  { %788 = vmatpush.msrb.mxu2 %v2157_v4  ;;  %808 = vmatpush.msrb.mxu3 %v2155_v3 }
  0x8c   :  { %749 = vmatpush.msrb.mxu0 %v2159_v5  ;;  %769 = vmatpush.msrb.mxu1 %v2161_v6 }
  0x8d   :  { %789 = vmatpush.msrb.mxu2 %v2167_v8  ;;  %809 = vmatpush.msrb.mxu3 %v2165_v7 }
  0x8e   :  { %750 = vmatpush.msrb.mxu0 %v2170_v9  ;;  %770 = vmatpush.msrb.mxu1 %v2172_v10 }
  0x8f   :  { %790 = vmatpush.msrb.mxu2 %v2179_v12  ;;  %810 = vmatpush.msrb.mxu3 %v2177_v11 }
  0x90   :  { %751 = vmatpush.msrb.mxu0 %v2185_v14  ;;  %771 = vmatpush.msrb.mxu1 %v2187_v15 }
  0x91   :  { %791 = vmatpush.msrb.mxu2 %v2193_v17  ;;  %811 = vmatpush.msrb.mxu3 %v2191_v16 }
  0x92   :  { %752 = vmatpush.msrb.mxu0 %v2195_v18  ;;  %772 = vmatpush.msrb.mxu1 %v2197_v19 }
  0x93   :  { %792 = vmatpush.msrb.mxu2 %v2203_v21  ;;  %812 = vmatpush.msrb.mxu3 %v2201_v20 }
  0x94   :  { %753 = vmatpush.msrb.mxu0 %v2206_v22  ;;  %773 = vmatpush.msrb.mxu1 %v2208_v23 }
  0x95   :  { %793 = vmatpush.msrb.mxu2 %v2215_v25  ;;  %813 = vmatpush.msrb.mxu3 %v2213_v24 }
  0x96   :  { %754 = vmatpush.msrb.mxu0 %v2221_v27  ;;  %774 = vmatpush.msrb.mxu1 %v2223_v28 }
  0x97   :  { %794 = vmatpush.msrb.mxu2 %v2229_v30  ;;  %814 = vmatpush.msrb.mxu3 %v2227_v29 }
  0x98   :  { %755 = vmatpush.msrb.mxu0 %v2231_v31  ;;  %775 = vmatpush.msrb.mxu1 %v2233_v32 }
  0x99   :  { %795 = vmatpush.msrb.mxu2 %v2239_v34  ;;  %815 = vmatpush.msrb.mxu3 %v2237_v33 }
  0x9a   :  { %756 = vmatpush.msrb.mxu0 %v2242_v35  ;;  %776 = vmatpush.msrb.mxu1 %v2244_v36 }
  0x9b   :  { %796 = vmatpush.msrb.mxu2 %v2251_v38  ;;  %816 = vmatpush.msrb.mxu3 %v2249_v37 }
  0x9c   :  { %757 = vmatpush.msrb.mxu0 %v2257_v40  ;;  %777 = vmatpush.msrb.mxu1 %v2259_v41 }
  0x9d   :  { %797 = vmatpush.msrb.mxu2 %v2265_v43  ;;  %817 = vmatpush.msrb.mxu3 %v2263_v42 }
  0x9e   :  { %758 = vmatpush.msrb.mxu0 %v2267_v44  ;;  %778 = vmatpush.msrb.mxu1 %v2269_v45 }
  0x9f   :  { %798 = vmatpush.msrb.mxu2 %v2275_v47  ;;  %818 = vmatpush.msrb.mxu3 %v2273_v46 }
  0xa0   :  { %759 = vmatpush.msrb.mxu0 %v2278_v48  ;;  %779 = vmatpush.msrb.mxu1 %v2280_v49 }
  0xa1   :  { %799 = vmatpush.msrb.mxu2 %v2287_v51  ;;  %819 = vmatpush.msrb.mxu3 %v2285_v50 }
  0xa2   :  { %760 = vmatpush.msrb.mxu0 %v2293_v53  ;;  %780 = vmatpush.msrb.mxu1 %v2295_v54 }
  0xa3   :  { %800 = vmatpush.msrb.mxu2 %v2301_v56  ;;  %820 = vmatpush.msrb.mxu3 %v2299_v55 }
  0xa4   :  { %761 = vmatpush.msrb.mxu0 %v2303_v57  ;;  %781 = vmatpush.msrb.mxu1 %v3173_v13  ;;  %v172_v57 = vld [vmem:[#allocation9] sm:$0xf] }
  0xa5   :  { %801 = vmatpush.msrb.mxu2 %v2311_v60  ;;  %821 = vmatpush.msrb.mxu3 %v2309_v59  ;;  %v174_v59 = vperm.slane %v172_v57, 0  ;;  %v175_v55 = vperm.slane %v172_v57, 1 }
  0xa6   :  { %762 = vmatpush.msrb.mxu0 %v2314_v61  ;;  %782 = vmatpush.msrb.mxu1 %v2316_v62 }
  0xa7   :  { %802 = vmatpush.msrb.mxu2 %v2321_v63  ;;  %822 = vmatpush.msrb.mxu3 %v3174_v0 }
  0xa8   :  { %763 = vmatpush.msrb.mxu0 %v2329_v26  ;;  %783 = vmatpush.msrb.mxu1 %v2331_v39  ;;  %v2479_v39 = vperm.slane %v172_v57, 2 }
  0xa9   :  { %803 = vmatpush.msrb.mxu2 %v2335_v52  ;;  %823 = vmatpush.msrb.mxu3 %v2337_v58  ;;  %v177_v52 = vperm.slane %v172_v57, 3 }
  0xb5   :  { %v199_v13 = vpop.f32.mrf.mxu0  ;;  %v240_v60 = vpop.f32.mrf.mxu1 }
  0xbc   :  { %v2471_v61 = vpop.f32.mrf.mxu2  ;;  %v2473_v62 = vpop.f32.mrf.mxu3 }
  0xbd   :  { %v202_v63 = vpop.f32.mrf.mxu0  ;;  %v243_v56 = vpop.f32.mrf.mxu1 }
  0xbe   :  { %v2475_v0 = vadd.f32 %v202_v63, %v174_v59  ;;  %v2477_v26 = vadd.f32 %v243_v56, %v175_v55 }
  0xc0   :  { %3175 = vst [vmem:[#allocation43_spill] sm:$0xff] %v2475_v0 }
  0xc1   :  { %3176 = vst [vmem:[#allocation44_spill] sm:$0xff] %v2477_v26 }
  0xc4   :  { %v284_v54 = vpop.f32.mrf.mxu2  ;;  %v325_v58 = vpop.f32.mrf.mxu3 }
  0xc5   :  { %v2482_v53 = vadd.f32 %v284_v54, %v2479_v39  ;;  %v2484_v50 = vadd.f32 %v325_v58, %v177_v52  ;;  %v205_v51 = vpop.f32.mrf.mxu0  ;;  %v246_v49 = vpop.f32.mrf.mxu1 }
  0xc6   :  { %v2486_v48 = vadd.f32 %v205_v51, %v174_v59  ;;  %v2488_v46 = vadd.f32 %v246_v49, %v175_v55 }
  0xc7   :  { %3177 = vst [vmem:[#allocation45_spill] sm:$0xff] %v2482_v53 }
  0xc8   :  { %3178 = vst [vmem:[#allocation46_spill] sm:$0xff] %v2484_v50 }
  0xc9   :  { %3179 = vst [vmem:[#allocation47_spill] sm:$0xff] %v2486_v48 }
  0xca   :  { %3180 = vst [vmem:[#allocation48_spill] sm:$0xff] %v2488_v46 }
  0xcc   :  { %v287_v63 = vpop.f32.mrf.mxu2  ;;  %v328_v0 = vpop.f32.mrf.mxu3 }
  0xcd   :  { %v2491_v56 = vadd.f32 %v287_v63, %v2479_v39  ;;  %v2493_v26 = vadd.f32 %v328_v0, %v177_v52  ;;  %v208_v57 = vpop.f32.mrf.mxu0  ;;  %v249_v47 = vpop.f32.mrf.mxu1 }
  0xce   :  { %v2495_v45 = vadd.f32 %v208_v57, %v174_v59  ;;  %v2497_v54 = vadd.f32 %v249_v47, %v175_v55 }
  0xcf   :  { %3181 = vst [vmem:[#allocation49_spill] sm:$0xff] %v2491_v56 }
  0xd0   :  { %3182 = vst [vmem:[#allocation50_spill] sm:$0xff] %v2493_v26 }
  0xd1   :  { %3183 = vst [vmem:[#allocation51_spill] sm:$0xff] %v2495_v45 }
  0xd2   :  { %3184 = vst [vmem:[#allocation52_spill] sm:$0xff] %v2497_v54 }
  0xd4   :  { %v290_v58 = vpop.f32.mrf.mxu2  ;;  %v331_v53 = vpop.f32.mrf.mxu3 }
  0xd5   :  { %v2500_v51 = vadd.f32 %v290_v58, %v2479_v39  ;;  %v2502_v49 = vadd.f32 %v331_v53, %v177_v52  ;;  %v211_v46 = vpop.f32.mrf.mxu0  ;;  %v252_v48 = vpop.f32.mrf.mxu1 }
  0xd6   :  { %v2504_v50 = vadd.f32 %v211_v46, %v174_v59  ;;  %v2506_v63 = vadd.f32 %v252_v48, %v175_v55 }
  0xd7   :  { %3185 = vst [vmem:[#allocation53_spill] sm:$0xff] %v2500_v51 }
  0xd8   :  { %3186 = vst [vmem:[#allocation54_spill] sm:$0xff] %v2502_v49 }
  0xd9   :  { %3187 = vst [vmem:[#allocation55_spill] sm:$0xff] %v2504_v50 }
  0xda   :  { %3188 = vst [vmem:[#allocation56_spill] sm:$0xff] %v2506_v63 }
  0xdc   :  { %v293_v0 = vpop.f32.mrf.mxu2  ;;  %v334_v56 = vpop.f32.mrf.mxu3 }
  0xdd   :  { %v2509_v57 = vadd.f32 %v293_v0, %v2479_v39  ;;  %v2511_v47 = vadd.f32 %v334_v56, %v177_v52  ;;  %v214_v54 = vpop.f32.mrf.mxu0  ;;  %v255_v45 = vpop.f32.mrf.mxu1 }
  0xde   :  { %v2513_v26 = vadd.f32 %v214_v54, %v174_v59  ;;  %v2515_v58 = vadd.f32 %v255_v45, %v175_v55 }
  0xdf   :  { %3189 = vst [vmem:[#allocation57_spill] sm:$0xff] %v2509_v57 }
  0xe0   :  { %3190 = vst [vmem:[#allocation58_spill] sm:$0xff] %v2511_v47 }
  0xe1   :  { %3191 = vst [vmem:[#allocation59_spill] sm:$0xff] %v2513_v26 }
  0xe2   :  { %3192 = vst [vmem:[#allocation60_spill] sm:$0xff] %v2515_v58 }
  0xe4   :  { %v296_v53 = vpop.f32.mrf.mxu2  ;;  %v337_v51 = vpop.f32.mrf.mxu3 }
  0xe5   :  { %v2518_v46 = vadd.f32 %v296_v53, %v2479_v39  ;;  %v2520_v48 = vadd.f32 %v337_v51, %v177_v52  ;;  %v217_v63 = vpop.f32.mrf.mxu0  ;;  %v258_v50 = vpop.f32.mrf.mxu1  ;;  %v200_v51 = vadd.f32 %v199_v13, %v174_v59 }
  0xe6   :  { %v2522_v49 = vadd.f32 %v217_v63, %v174_v59  ;;  %v2524_v0 = vadd.f32 %v258_v50, %v175_v55 }
  0xe7   :  { %3193 = vst [vmem:[#allocation61_spill] sm:$0xff] %v2518_v46  ;;  %v241_v46 = vadd.f32 %v240_v60, %v175_v55 }
  0xe8   :  { %3194 = vst [vmem:[#allocation62_spill] sm:$0xff] %v2520_v48 }
  0xe9   :  { %3195 = vst [vmem:[#allocation63_spill] sm:$0xff] %v2522_v49 }
  0xea   :  { %3196 = vst [vmem:[#allocation64_spill] sm:$0xff] %v2524_v0 }
  0xec   :  { %v299_v56 = vpop.f32.mrf.mxu2  ;;  %v340_v57 = vpop.f32.mrf.mxu3 }
  0xed   :  { %v2527_v54 = vadd.f32 %v299_v56, %v2479_v39  ;;  %v2529_v45 = vadd.f32 %v340_v57, %v177_v52  ;;  %v220_v58 = vpop.f32.mrf.mxu0  ;;  %v261_v26 = vpop.f32.mrf.mxu1 }
  0xee   :  { %v2531_v47 = vadd.f32 %v220_v58, %v174_v59  ;;  %v2533_v53 = vadd.f32 %v261_v26, %v175_v55  ;;  %v323_v58 = vadd.f32 %v2473_v62, %v177_v52 }
  0xef   :  { %3197 = vst [vmem:[#allocation65_spill] sm:$0xff] %v2527_v54 }
  0xf0   :  { %3198 = vst [vmem:[#allocation66_spill] sm:$0xff] %v2529_v45 }
  0xf1   :  { %3199 = vst [vmem:[#allocation67_spill] sm:$0xff] %v2531_v47 }
  0xf2   :  { %3200 = vst [vmem:[#allocation68_spill] sm:$0xff] %v2533_v53 }
  0xf4   :  { %v302_v48 = vpop.f32.mrf.mxu2  ;;  %v343_v63 = vpop.f32.mrf.mxu3 }
  0xf5   :  { %v2536_v50 = vadd.f32 %v302_v48, %v2479_v39  ;;  %v2538_v0 = vadd.f32 %v343_v63, %v177_v52  ;;  %v463_v49 = vpop.f32.mrf.mxu0  ;;  %v483_v56 = vpop.f32.mrf.mxu1 }
  0xf6   :  { %v526_v54 = vadd.f32 %v463_v49, %v200_v51  ;;  %v527_v57 = vadd.f32 %v483_v56, %v241_v46  ;;  %v282_v49 = vadd.f32 %v2471_v61, %v2479_v39 }
  0xf7   :  { %3201 = vst [vmem:[#allocation69_spill] sm:$0xff] %v2536_v50 }
  0xf8   :  { %3202 = vst [vmem:[#allocation70_spill] sm:$0xff] %v2538_v0  ;;  %v1710_v45 = vmul.f32 -1.442695, %v526_v54  ;;  %v1711_v44 = vmul.f32 -1.442695, %v527_v57 }
  0xfa   :  { %1746 = vpow2.f32 %v1710_v45 }
  0xfb   :  { %1748 = vpow2.f32 %v1711_v44 }
  0xfc   :  { %v523_v26 = vpop.f32.mrf.mxu3  ;;  %v503_v63 = vpop.f32.mrf.mxu2 }
  0xfd   :  { %v529_v59 = vadd.f32 %v523_v26, %v323_v58  ;;  %v528_v45 = vadd.f32 %v503_v63, %v282_v49 }
  0xff   :  { %v1712_v55 = vmul.f32 -1.442695, %v529_v59 }
 0x100   :  { %v1747_v60 = vpop.eup %1746 }
 0x101   :  { %v1749_v13 = vpop.eup %1748  ;;  %v533_v53 = vadd.f32 1.0, %v1747_v60  ;;  %1750 = vpow2.f32 %v1712_v55 }
 0x102   :  { %v552_v48 = vadd.f32 1.0, %v1749_v13 }
 0x103   :  { %1752 = vrcp.f32 %v533_v53  ;;  %v545_v57 = vand.u32 2147483648, %v533_v53  ;;  %v543_v59 = vand.u32 2147483647, %v533_v53  ;;  %vm539_vm2 = vweird.f32 %v533_v53 }
 0x104   :  { %1754 = vrcp.f32 %v552_v48  ;;  %v564_v58 = vand.u32 2147483648, %v552_v48  ;;  %v562_v60 = vand.u32 2147483647, %v552_v48  ;;  %vm558_vm3 = vweird.f32 %v552_v48 }
 0x105   :  { %v546_v39 = vor.u32 1.1754944e-38, %v545_v57  ;;  %vm544_vm5 = vcmp.eq.f32.partialorder %v543_v59, 8.507059e+37 }
 0x106   :  { %v565_v49 = vor.u32 1.1754944e-38, %v564_v58  ;;  %vm563_vm7 = vcmp.eq.f32.partialorder %v562_v60, 8.507059e+37 }
 0x107   :  { %v1751_v50 = vpop.eup %1750 }
 0x108   :  { %v572_v46 = vadd.f32 1.0, %v1751_v50 }
 0x109   :  { %v1753_v54 = vpop.eup %1752 }
 0x10a   :  { %v1755_v62 = vpop.eup %1754  ;;  %v535_v44 = vmul.f32 %v1753_v54, %v533_v53  ;;  %1756 = vrcp.f32 %v572_v46  ;;  %vm540_vm0 = vweird.f32 %v1753_v54  ;;  %vm578_vm9 = vweird.f32 %v572_v46 }
 0x10b   :  { %v554_v52 = vmul.f32 %v1755_v62, %v552_v48  ;;  %1758 = vtanh.f32 %v528_v45  ;;  %vm559_vm1 = vweird.f32 %v1755_v62  ;;  %vm541_vm4 = vmor %vm539_vm2, %vm540_vm0  ;;  %v584_v48 = vand.u32 2147483648, %v572_v46 }
 0x10c   :  { %v536_v51 = vsub.f32 1.0, %v535_v44  ;;  %vm560_vm6 = vmor %vm558_vm3, %vm559_vm1 }
 0x10d   :  { %v555_v56 = vsub.f32 1.0, %v554_v52  ;;  %v585_v58 = vor.u32 1.1754944e-38, %v584_v48 }
 0x10e   :  { %v537_v26 = vmul.f32 %v1753_v54, %v536_v51 }
 0x10f   :  { %v556_v55 = vmul.f32 %v1755_v62, %v555_v56 }
 0x110   :  { %v1757_v13 = vpop.eup %1756  ;;  %v538_v61 = vadd.f32 %v1753_v54, %v537_v26 }
 0x111   :  { %v557_v50 = vadd.f32 %v1755_v62, %v556_v55  ;;  %v574_v63 = vmul.f32 %v1757_v13, %v572_v46  ;;  %v1759_v45 = vpop.eup %1758  ;;  %vm579_vm8 = vweird.f32 %v1757_v13 }
 0x112   :  { %v542_v44 = vsel %vm541_vm4, %v1753_v54, %v538_v61  ;;  %v582_v54 = vand.u32 2147483647, %v572_v46  ;;  %vm580_vm10 = vmor %vm578_vm9, %vm579_vm8 }
 0x113   :  { %v547_v52 = vsel %vm544_vm5, %v546_v39, %v542_v44  ;;  %v561_v51 = vsel %vm560_vm6, %v1755_v62, %v557_v50  ;;  %v575_v0 = vsub.f32 1.0, %v574_v63  ;;  %v3232_v39 = vld [vmem:[#allocation45_spill] sm:$0xff] }
 0x114   :  { %v566_v56 = vsel %vm563_vm7, %v565_v49, %v561_v51  ;;  %v589_v47 = vmul.f32 %v1759_v45, %v547_v52  ;;  %vm583_vm11 = vcmp.eq.f32.partialorder %v582_v54, 8.507059e+37 }
 0x115   :  { %v588_v42 = vmul.f32 0.0, %v566_v56  ;;  %v576_v43 = vmul.f32 %v1757_v13, %v575_v0 }
 0x117   :  { %v2543_v26 = vadd.f32 %v589_v47, %v588_v42  ;;  %v577_v53 = vadd.f32 %v1757_v13, %v576_v43 }
 0x119   :  { %1760 = vtanh.f32 %v2543_v26  ;;  %v581_v57 = vsel %vm580_vm10, %v1757_v13, %v577_v53 }
 0x11a   :  { %v586_v59 = vsel %vm583_vm11, %v585_v58, %v581_v57 }
 0x11f   :  { %v1761_v62 = vpop.eup %1760 }
 0x120   :  { %v592_v55 = vmul.f32 %v1761_v62, %v586_v59 }
 0x122   :  { %613 = vmatmul.f32.vlgmr.msra.gmra.mxu0 %v592_v55  ;;  %633 = vmatmul.f32.vlgmr.msra.gmra.mxu1 %v592_v55 }
 0x123   :  { %653 = vmatmul.f32.vlgmr.msra.gmra.mxu2 %v592_v55  ;;  %673 = vmatmul.f32.vlgmr.msra.gmra.mxu3 %v592_v55 }
 0x124   :  { %899 = vmatpush.msra.mxu0 %v2151_v1  ;;  %919 = vmatpush.msra.mxu1 %v2153_v2  ;;  %v3203_v1 = vld [vmem:[#allocation18_spill] sm:$0xff]  ;;  %v3204_v2 = vld [vmem:[#allocation17_spill] sm:$0xff] }
 0x125   :  { %939 = vmatpush.msra.mxu2 %v2157_v4  ;;  %959 = vmatpush.msra.mxu3 %v2155_v3  ;;  %v3205_v3 = vld [vmem:[#allocation19_spill] sm:$0xff]  ;;  %v3206_v4 = vld [vmem:[#allocation20_spill] sm:$0xff] }
 0x126   :  { %900 = vmatpush.msra.mxu0 %v2159_v5  ;;  %920 = vmatpush.msra.mxu1 %v2161_v6  ;;  %v3207_v5 = vld [vmem:[#allocation22_spill] sm:$0xff]  ;;  %v3208_v6 = vld [vmem:[#allocation21_spill] sm:$0xff] }
 0x127   :  { %940 = vmatpush.msra.mxu2 %v2167_v8  ;;  %960 = vmatpush.msra.mxu3 %v2165_v7  ;;  %v3209_v7 = vld [vmem:[#allocation23_spill] sm:$0xff]  ;;  %v3210_v8 = vld [vmem:[#allocation24_spill] sm:$0xff] }
 0x128   :  { %901 = vmatpush.msra.mxu0 %v2170_v9  ;;  %921 = vmatpush.msra.mxu1 %v2172_v10  ;;  %v3211_v9 = vld [vmem:[#allocation26_spill] sm:$0xff]  ;;  %v3212_v10 = vld [vmem:[#allocation25_spill] sm:$0xff] }
 0x129   :  { %941 = vmatpush.msra.mxu2 %v2179_v12  ;;  %961 = vmatpush.msra.mxu3 %v2177_v11  ;;  %v3213_v11 = vld [vmem:[#allocation27_spill] sm:$0xff]  ;;  %v3214_v12 = vld [vmem:[#allocation28_spill] sm:$0xff] }
 0x12a   :  { %902 = vmatpush.msra.mxu0 %v2185_v14  ;;  %922 = vmatpush.msra.mxu1 %v2187_v15  ;;  %v3215_v14 = vld [vmem:[#allocation30_spill] sm:$0xff]  ;;  %v3216_v15 = vld [vmem:[#allocation29_spill] sm:$0xff] }
 0x12b   :  { %942 = vmatpush.msra.mxu2 %v2193_v17  ;;  %962 = vmatpush.msra.mxu3 %v2191_v16  ;;  %v3217_v16 = vld [vmem:[#allocation31_spill] sm:$0xff]  ;;  %v3218_v17 = vld [vmem:[#allocation32_spill] sm:$0xff] }
 0x12c   :  { %903 = vmatpush.msra.mxu0 %v2195_v18  ;;  %923 = vmatpush.msra.mxu1 %v2197_v19  ;;  %v3219_v18 = vld [vmem:[#allocation34_spill] sm:$0xff]  ;;  %v3220_v19 = vld [vmem:[#allocation33_spill] sm:$0xff] }
 0x12d   :  { %943 = vmatpush.msra.mxu2 %v2203_v21  ;;  %963 = vmatpush.msra.mxu3 %v2201_v20  ;;  %v3221_v20 = vld [vmem:[#allocation35_spill] sm:$0xff]  ;;  %v3222_v21 = vld [vmem:[#allocation36_spill] sm:$0xff] }
 0x12e   :  { %904 = vmatpush.msra.mxu0 %v2206_v22  ;;  %924 = vmatpush.msra.mxu1 %v2208_v23  ;;  %v3223_v22 = vld [vmem:[#allocation37_spill] sm:$0xff]  ;;  %v3224_v23 = vld [vmem:[#allocation38_spill] sm:$0xff] }
 0x12f   :  { %944 = vmatpush.msra.mxu2 %v2215_v25  ;;  %964 = vmatpush.msra.mxu3 %v2213_v24  ;;  %v3225_v24 = vld [vmem:[#allocation39_spill] sm:$0xff]  ;;  %v3226_v25 = vld [vmem:[#allocation40_spill] sm:$0xff] }
 0x130   :  { %905 = vmatpush.msra.mxu0 %v2221_v27  ;;  %925 = vmatpush.msra.mxu1 %v2223_v28  ;;  %v3227_v27 = vld [vmem:[#allocation41_spill] sm:$0xff]  ;;  %v3228_v28 = vld [vmem:[#allocation42_spill] sm:$0xff] }
 0x131   :  { %945 = vmatpush.msra.mxu2 %v2229_v30  ;;  %965 = vmatpush.msra.mxu3 %v2227_v29 }
 0x132   :  { %906 = vmatpush.msra.mxu0 %v2231_v31  ;;  %926 = vmatpush.msra.mxu1 %v2233_v32  ;;  %v3229_v31 = vld [vmem:[#allocation43_spill] sm:$0xff] }
 0x133   :  { %946 = vmatpush.msra.mxu2 %v2239_v34  ;;  %966 = vmatpush.msra.mxu3 %v2237_v33  ;;  %v3230_v33 = vld [vmem:[#allocation44_spill] sm:$0xff] }
 0x134   :  { %907 = vmatpush.msra.mxu0 %v2242_v35  ;;  %927 = vmatpush.msra.mxu1 %v2244_v36 }
 0x135   :  { %947 = vmatpush.msra.mxu2 %v2251_v38  ;;  %967 = vmatpush.msra.mxu3 %v2249_v37  ;;  %v3231_v38 = vld [vmem:[#allocation46_spill] sm:$0xff] }
 0x136   :  { %908 = vmatpush.msra.mxu0 %v2257_v40  ;;  %928 = vmatpush.msra.mxu1 %v2259_v41 }
 0x137   :  { %948 = vmatpush.msra.mxu2 %v3203_v1  ;;  %968 = vmatpush.msra.mxu3 %v3204_v2 }
 0x138   :  { %909 = vmatpush.msra.mxu0 %v3205_v3  ;;  %929 = vmatpush.msra.mxu1 %v3206_v4 }
 0x139   :  { %949 = vmatpush.msra.mxu2 %v3207_v5  ;;  %969 = vmatpush.msra.mxu3 %v3208_v6 }
 0x13a   :  { %910 = vmatpush.msra.mxu0 %v3209_v7  ;;  %930 = vmatpush.msra.mxu1 %v3210_v8 }
 0x13b   :  { %950 = vmatpush.msra.mxu2 %v3211_v9  ;;  %970 = vmatpush.msra.mxu3 %v3212_v10 }
 0x13c   :  { %911 = vmatpush.msra.mxu0 %v3213_v11  ;;  %931 = vmatpush.msra.mxu1 %v3214_v12 }
 0x13d   :  { %951 = vmatpush.msra.mxu2 %v3215_v14  ;;  %971 = vmatpush.msra.mxu3 %v3216_v15 }
 0x13e   :  { %912 = vmatpush.msra.mxu0 %v3217_v16  ;;  %932 = vmatpush.msra.mxu1 %v3218_v17 }
 0x13f   :  { %952 = vmatpush.msra.mxu2 %v3219_v18  ;;  %972 = vmatpush.msra.mxu3 %v3220_v19 }
 0x140   :  { %913 = vmatpush.msra.mxu0 %v3221_v20  ;;  %933 = vmatpush.msra.mxu1 %v3222_v21 }
 0x141   :  { %953 = vmatpush.msra.mxu2 %v3223_v22  ;;  %973 = vmatpush.msra.mxu3 %v3224_v23 }
 0x142   :  { %914 = vmatpush.msra.mxu0 %v3225_v24  ;;  %934 = vmatpush.msra.mxu1 %v3226_v25 }
 0x143   :  { %954 = vmatpush.msra.mxu2 %v3227_v27  ;;  %974 = vmatpush.msra.mxu3 %v3228_v28 }
 0x19f   :  { %v614_v29 = vpop.f32.mrf.mxu0  ;;  %v634_v30 = vpop.f32.mrf.mxu1 }
 0x1a0   :  { %v677_v32 = vadd.f32 %v614_v29, %v3229_v31  ;;  %v678_v34 = vadd.f32 %v634_v30, %v3230_v33  ;;  %v2621_v29 = vld [vmem:[#allocation8 + $0x1e8] sm:$0xff]  ;;  %v2624_v30 = vld [vmem:[#allocation8 + $0x1f0] sm:$0xff]  ;;  %v2627_v31 = vld [vmem:[#allocation8 + $0x1f8] sm:$0xff] }
 0x1a1   :  { %v2633_v33 = vld [vmem:[#allocation8 + $0x1c8] sm:$0xff] }
 0x1a2   :  { %v1713_v35 = vmul.f32 -1.442695, %v677_v32  ;;  %v1714_v36 = vmul.f32 -1.442695, %v678_v34  ;;  %v2630_v32 = vld [vmem:[#allocation8 + $0x1c0] sm:$0xff]  ;;  %v2636_v34 = vld [vmem:[#allocation8 + $0x1d0] sm:$0xff] }
 0x1a4   :  { %1762 = vpow2.f32 %v1713_v35  ;;  %v2639_v35 = vld [vmem:[#allocation8 + $0x1d8] sm:$0xff] }
 0x1a5   :  { %1764 = vpow2.f32 %v1714_v36  ;;  %v2642_v36 = vld [vmem:[#allocation8 + $0x1a0] sm:$0xff] }
 0x1a6   :  { %v674_v37 = vpop.f32.mrf.mxu3  ;;  %v654_v46 = vpop.f32.mrf.mxu2 }
 0x1a7   :  { %v680_v40 = vadd.f32 %v674_v37, %v3231_v38  ;;  %v679_v50 = vadd.f32 %v654_v46, %v3232_v39  ;;  %v2645_v37 = vld [vmem:[#allocation8 + $0x1a8] sm:$0xff]  ;;  %v2648_v38 = vld [vmem:[#allocation8 + $0x1b0] sm:$0xff] }
 0x1a8   :  { %v2669_v46 = vld [vmem:[#allocation8 + $0x168] sm:$0xff] }
 0x1a9   :  { %v1715_v41 = vmul.f32 -1.442695, %v680_v40  ;;  %v2651_v40 = vld [vmem:[#allocation8 + $0x1b8] sm:$0xff]  ;;  %v2681_v39 = vld [vmem:[#allocation8 + $0x148] sm:$0xff] }
 0x1aa   :  { %v1763_v42 = vpop.eup %1762 }
 0x1ab   :  { %v1765_v43 = vpop.eup %1764  ;;  %v684_v47 = vadd.f32 1.0, %v1763_v42  ;;  %1766 = vpow2.f32 %v1715_v41  ;;  %v2654_v41 = vld [vmem:[#allocation8 + $0x180] sm:$0xff]  ;;  %v2657_v42 = vld [vmem:[#allocation8 + $0x188] sm:$0xff] }
 0x1ac   :  { %v703_v0 = vadd.f32 1.0, %v1765_v43  ;;  %v2660_v43 = vld [vmem:[#allocation8 + $0x190] sm:$0xff] }
 0x1ad   :  { %1768 = vrcp.f32 %v684_v47  ;;  %v696_v51 = vand.u32 2147483648, %v684_v47  ;;  %v694_v48 = vand.u32 2147483647, %v684_v47  ;;  %vm690_vm14 = vweird.f32 %v684_v47 }
 0x1ae   :  { %1770 = vrcp.f32 %v703_v0  ;;  %v715_v56 = vand.u32 2147483648, %v703_v0  ;;  %v713_v57 = vand.u32 2147483647, %v703_v0  ;;  %vm709_vm15 = vweird.f32 %v703_v0 }
 0x1af   :  { %v697_v59 = vor.u32 1.1754944e-38, %v696_v51  ;;  %vm695_vm2 = vcmp.eq.f32.partialorder %v694_v48, 8.507059e+37  ;;  %v2702_v51 = vld [vmem:[#allocation8 + $0x100] sm:$0xff]  ;;  %v2711_v48 = vld [vmem:[#allocation8 + $0x118] sm:$0xff] }
 0x1b0   :  { %v716_v2 = vor.u32 1.1754944e-38, %v715_v56  ;;  %vm714_vm3 = vcmp.eq.f32.partialorder %v713_v57, 8.507059e+37  ;;  %v2705_v56 = vld [vmem:[#allocation8 + $0x108] sm:$0xff] }
 0x1b1   :  { %v1767_v60 = vpop.eup %1766  ;;  %v2717_v57 = vld [vmem:[#allocation8 + $0xe8] sm:$0xff] }
 0x1b2   :  { %v723_v13 = vadd.f32 1.0, %v1767_v60  ;;  %v2672_v60 = vld [vmem:[#allocation8 + $0x170] sm:$0xff] }
 0x1b3   :  { %v1769_v61 = vpop.eup %1768 }
 0x1b4   :  { %v1771_v63 = vpop.eup %1770  ;;  %v686_v49 = vmul.f32 %v1769_v61, %v684_v47  ;;  %1772 = vrcp.f32 %v723_v13  ;;  %vm691_vm12 = vweird.f32 %v1769_v61  ;;  %v735_v15 = vand.u32 2147483648, %v723_v13  ;;  %v2663_v47 = vld [vmem:[#allocation8 + $0x198] sm:$0xff] }
 0x1b5   :  { %v705_v44 = vmul.f32 %v1771_v63, %v703_v0  ;;  %1774 = vtanh.f32 %v679_v50  ;;  %vm710_vm13 = vweird.f32 %v1771_v63  ;;  %vm692_vm0 = vmor %vm690_vm14, %vm691_vm12  ;;  %vm729_vm5 = vweird.f32 %v723_v13  ;;  %v2666_v0 = vld [vmem:[#allocation8 + $0x160] sm:$0xff]  ;;  %v2684_v50 = vld [vmem:[#allocation8 + $0x150] sm:$0xff] }
 0x1b6   :  { %v687_v45 = vsub.f32 1.0, %v686_v49  ;;  %vm711_vm1 = vmor %vm709_vm15, %vm710_vm13  ;;  %v733_v16 = vand.u32 2147483647, %v723_v13  ;;  %v736_v18 = vor.u32 1.1754944e-38, %v735_v15  ;;  %v2690_v49 = vld [vmem:[#allocation8 + $0x120] sm:$0xff]  ;;  %v2768_v15 = vld [vmem:[#allocation8 + $0x70] sm:$0xff] }
 0x1b7   :  { %v706_v52 = vsub.f32 1.0, %v705_v44  ;;  %v2693_v44 = vld [vmem:[#allocation8 + $0x128] sm:$0xff]  ;;  %3245 = vst [vmem:[#allocation30_spill] sm:$0xff] %v2768_v15 }
 0x1b8   :  { %v688_v53 = vmul.f32 %v1769_v61, %v687_v45  ;;  %vm734_vm7 = vcmp.eq.f32.partialorder %v733_v16, 8.507059e+37  ;;  %v2696_v45 = vld [vmem:[#allocation8 + $0x130] sm:$0xff]  ;;  %v2771_v16 = vld [vmem:[#allocation8 + $0x78] sm:$0xff] }
 0x1b9   :  { %v707_v54 = vmul.f32 %v1771_v63, %v706_v52  ;;  %v2699_v52 = vld [vmem:[#allocation8 + $0x138] sm:$0xff]  ;;  %3246 = vst [vmem:[#allocation29_spill] sm:$0xff] %v2771_v16 }
 0x1ba   :  { %v1773_v58 = vpop.eup %1772  ;;  %v689_v62 = vadd.f32 %v1769_v61, %v688_v53  ;;  %v2708_v53 = vld [vmem:[#allocation8 + $0x110] sm:$0xff] }
 0x1bb   :  { %v708_v55 = vadd.f32 %v1771_v63, %v707_v54  ;;  %v725_v1 = vmul.f32 %v1773_v58, %v723_v13  ;;  %v1775_v4 = vpop.eup %1774  ;;  %vm730_vm4 = vweird.f32 %v1773_v58  ;;  %v2675_v13 = vld [vmem:[#allocation8 + $0x178] sm:$0xff]  ;;  %v2714_v54 = vld [vmem:[#allocation8 + $0xe0] sm:$0xff] }
 0x1bc   :  { %v693_v3 = vsel %vm692_vm0, %v1769_v61, %v689_v62  ;;  %vm731_vm6 = vmor %vm729_vm5, %vm730_vm4  ;;  %v2678_v61 = vld [vmem:[#allocation8 + $0x140] sm:$0xff]  ;;  %v2723_v62 = vld [vmem:[#allocation8 + $0xf8] sm:$0xff] }
 0x1bd   :  { %v698_v5 = vsel %vm695_vm2, %v697_v59, %v693_v3  ;;  %v712_v6 = vsel %vm711_vm1, %v1771_v63, %v708_v55  ;;  %v726_v7 = vsub.f32 1.0, %v725_v1  ;;  %v2687_v63 = vld [vmem:[#allocation8 + $0x158] sm:$0xff]  ;;  %v2726_v59 = vld [vmem:[#allocation8 + $0xc0] sm:$0xff]  ;;  %v2729_v55 = vld [vmem:[#allocation8 + $0xc8] sm:$0xff] }
 0x1be   :  { %v717_v8 = vsel %vm714_vm3, %v716_v2, %v712_v6  ;;  %v740_v9 = vmul.f32 %v1775_v4, %v698_v5  ;;  %v2732_v1 = vld [vmem:[#allocation8 + $0xd0] sm:$0xff]  ;;  %v2735_v2 = vld [vmem:[#allocation8 + $0xd8] sm:$0xff]  ;;  %v2738_v3 = vld [vmem:[#allocation8 + $0xa0] sm:$0xff] }
 0x1bf   :  { %v739_v10 = vmul.f32 %v717_v8, %v2543_v26  ;;  %v727_v11 = vmul.f32 %v1773_v58, %v726_v7  ;;  %v2618_v26 = vld [vmem:[#allocation8 + $0x1e0] sm:$0xff]  ;;  %3233 = vst [vmem:[#allocation18_spill] sm:$0xff] %v2732_v1  ;;  %v2741_v4 = vld [vmem:[#allocation8 + $0xa8] sm:$0xff]  ;;  %v2744_v5 = vld [vmem:[#allocation8 + $0xb0] sm:$0xff] }
 0x1c0   :  { %3234 = vst [vmem:[#allocation17_spill] sm:$0xff] %v2735_v2  ;;  %v2747_v6 = vld [vmem:[#allocation8 + $0xb8] sm:$0xff]  ;;  %v2750_v7 = vld [vmem:[#allocation8 + $0x80] sm:$0xff]  ;;  %v2753_v8 = vld [vmem:[#allocation8 + $0x88] sm:$0xff] }
 0x1c1   :  { %v2615_v12 = vadd.f32 %v740_v9, %v739_v10  ;;  %v728_v14 = vadd.f32 %v1773_v58, %v727_v11  ;;  %3235 = vst [vmem:[#allocation19_spill] sm:$0xff] %v2738_v3  ;;  %v2756_v9 = vld [vmem:[#allocation8 + $0x90] sm:$0xff]  ;;  %v2759_v10 = vld [vmem:[#allocation8 + $0x98] sm:$0xff]  ;;  %v2762_v11 = vld [vmem:[#allocation8 + $0x60] sm:$0xff] }
 0x1c2   :  { %3236 = vst [vmem:[#allocation20_spill] sm:$0xff] %v2741_v4 }
 0x1c3   :  { %1776 = vtanh.f32 %v2615_v12  ;;  %v732_v17 = vsel %vm731_vm6, %v1773_v58, %v728_v14  ;;  %v2720_v58 = vld [vmem:[#allocation8 + $0xf0] sm:$0xff]  ;;  %3237 = vst [vmem:[#allocation22_spill] sm:$0xff] %v2744_v5  ;;  %v2765_v14 = vld [vmem:[#allocation8 + $0x68] sm:$0xff] }
 0x1c4   :  { %v737_v20 = vsel %vm734_vm7, %v736_v18, %v732_v17  ;;  %3238 = vst [vmem:[#allocation21_spill] sm:$0xff] %v2747_v6  ;;  %v2774_v17 = vld [vmem:[#allocation8 + $0x40] sm:$0xff]  ;;  %v2777_v18 = vld [vmem:[#allocation8 + $0x48] sm:$0xff] }
 0x1c5   :  { %3239 = vst [vmem:[#allocation23_spill] sm:$0xff] %v2750_v7 }
 0x1c6   :  { %3240 = vst [vmem:[#allocation24_spill] sm:$0xff] %v2753_v8 }
 0x1c7   :  { %3241 = vst [vmem:[#allocation26_spill] sm:$0xff] %v2756_v9 }
 0x1c8   :  { %3242 = vst [vmem:[#allocation25_spill] sm:$0xff] %v2759_v10 }
 0x1c9   :  { %v1777_v19 = vpop.eup %1776  ;;  %3243 = vst [vmem:[#allocation27_spill] sm:$0xff] %v2762_v11 }
 0x1ca   :  { %v743_v21 = vmul.f32 %v1777_v19, %v737_v20  ;;  %3244 = vst [vmem:[#allocation28_spill] sm:$0xff] %v2765_v14  ;;  %v2780_v19 = vld [vmem:[#allocation8 + $0x50] sm:$0xff]  ;;  %v2783_v20 = vld [vmem:[#allocation8 + $0x58] sm:$0xff] }
 0x1cb   :  { %3247 = vst [vmem:[#allocation31_spill] sm:$0xff] %v2774_v17 }
 0x1cc   :  { %764 = vmatmul.f32.vlgmr.msrb.gmra.mxu0 %v743_v21  ;;  %784 = vmatmul.f32.vlgmr.msrb.gmra.mxu1 %v743_v21  ;;  %3248 = vst [vmem:[#allocation32_spill] sm:$0xff] %v2777_v18 }
 0x1cd   :  { %804 = vmatmul.f32.vlgmr.msrb.gmra.mxu2 %v743_v21  ;;  %824 = vmatmul.f32.vlgmr.msrb.gmra.mxu3 %v743_v21  ;;  %3249 = vst [vmem:[#allocation34_spill] sm:$0xff] %v2780_v19  ;;  %v2786_v21 = vld [vmem:[#allocation8 + $0x20] sm:$0xff] }
 0x1ce   :  { %1050 = vmatpush.msrb.mxu0 %v2618_v26  ;;  %1070 = vmatpush.msrb.mxu1 %v2621_v29  ;;  %3250 = vst [vmem:[#allocation33_spill] sm:$0xff] %v2783_v20 }
 0x1cf   :  { %1090 = vmatpush.msrb.mxu2 %v2624_v30  ;;  %1110 = vmatpush.msrb.mxu3 %v2627_v31  ;;  %3251 = vst [vmem:[#allocation35_spill] sm:$0xff] %v2786_v21 }
 0x1d0   :  { %1051 = vmatpush.msrb.mxu0 %v2630_v32  ;;  %1071 = vmatpush.msrb.mxu1 %v2633_v33 }
 0x1d1   :  { %1091 = vmatpush.msrb.mxu2 %v2636_v34  ;;  %1111 = vmatpush.msrb.mxu3 %v2639_v35 }
 0x1d2   :  { %1052 = vmatpush.msrb.mxu0 %v2642_v36  ;;  %1072 = vmatpush.msrb.mxu1 %v2645_v37 }
 0x1d3   :  { %1092 = vmatpush.msrb.mxu2 %v2648_v38  ;;  %1112 = vmatpush.msrb.mxu3 %v2651_v40 }
 0x1d4   :  { %1053 = vmatpush.msrb.mxu0 %v2654_v41  ;;  %1073 = vmatpush.msrb.mxu1 %v2657_v42 }
 0x1d5   :  { %1093 = vmatpush.msrb.mxu2 %v2660_v43  ;;  %1113 = vmatpush.msrb.mxu3 %v2663_v47 }
 0x1d6   :  { %1054 = vmatpush.msrb.mxu0 %v2666_v0  ;;  %1074 = vmatpush.msrb.mxu1 %v2669_v46 }
 0x1d7   :  { %1094 = vmatpush.msrb.mxu2 %v2672_v60  ;;  %1114 = vmatpush.msrb.mxu3 %v2675_v13 }
 0x1d8   :  { %1055 = vmatpush.msrb.mxu0 %v2678_v61  ;;  %1075 = vmatpush.msrb.mxu1 %v2681_v39 }
 0x1d9   :  { %1095 = vmatpush.msrb.mxu2 %v2684_v50  ;;  %1115 = vmatpush.msrb.mxu3 %v2687_v63 }
 0x1da   :  { %1056 = vmatpush.msrb.mxu0 %v2690_v49  ;;  %1076 = vmatpush.msrb.mxu1 %v2693_v44 }
 0x1db   :  { %1096 = vmatpush.msrb.mxu2 %v2696_v45  ;;  %1116 = vmatpush.msrb.mxu3 %v2699_v52 }
 0x1dc   :  { %1057 = vmatpush.msrb.mxu0 %v2702_v51  ;;  %1077 = vmatpush.msrb.mxu1 %v2705_v56 }
 0x1dd   :  { %1097 = vmatpush.msrb.mxu2 %v2708_v53  ;;  %1117 = vmatpush.msrb.mxu3 %v2711_v48 }
 0x1de   :  { %1058 = vmatpush.msrb.mxu0 %v2714_v54  ;;  %1078 = vmatpush.msrb.mxu1 %v2717_v57 }
 0x1df   :  { %1098 = vmatpush.msrb.mxu2 %v2720_v58  ;;  %1118 = vmatpush.msrb.mxu3 %v2723_v62 }
 0x1e0   :  { %1059 = vmatpush.msrb.mxu0 %v2726_v59  ;;  %1079 = vmatpush.msrb.mxu1 %v2729_v55 }
 0x1e1   :  { %1099 = vmatpush.msrb.mxu2 %v2732_v1  ;;  %1119 = vmatpush.msrb.mxu3 %v2735_v2 }
 0x1e2   :  { %1060 = vmatpush.msrb.mxu0 %v2738_v3  ;;  %1080 = vmatpush.msrb.mxu1 %v2741_v4 }
 0x1e3   :  { %1100 = vmatpush.msrb.mxu2 %v2744_v5  ;;  %1120 = vmatpush.msrb.mxu3 %v2747_v6 }
 0x1e4   :  { %1061 = vmatpush.msrb.mxu0 %v2750_v7  ;;  %1081 = vmatpush.msrb.mxu1 %v2753_v8 }
 0x1e5   :  { %1101 = vmatpush.msrb.mxu2 %v2756_v9  ;;  %1121 = vmatpush.msrb.mxu3 %v2759_v10 }
 0x1e6   :  { %1062 = vmatpush.msrb.mxu0 %v2762_v11  ;;  %1082 = vmatpush.msrb.mxu1 %v2765_v14 }
 0x1e7   :  { %1102 = vmatpush.msrb.mxu2 %v2768_v15  ;;  %1122 = vmatpush.msrb.mxu3 %v2771_v16  ;;  %v2789_v16 = vld [vmem:[#allocation8 + $0x28] sm:$0xff] }
 0x1e8   :  { %1063 = vmatpush.msrb.mxu0 %v2774_v17  ;;  %1083 = vmatpush.msrb.mxu1 %v2777_v18  ;;  %3252 = vst [vmem:[#allocation36_spill] sm:$0xff] %v2789_v16  ;;  %v3253_v18 = vld [vmem:[#allocation47_spill] sm:$0xff]  ;;  %v3254_v17 = vld [vmem:[#allocation48_spill] sm:$0xff] }
 0x1e9   :  { %1103 = vmatpush.msrb.mxu2 %v2780_v19  ;;  %1123 = vmatpush.msrb.mxu3 %v2783_v20 }
 0x1ea   :  { %1064 = vmatpush.msrb.mxu0 %v2786_v21  ;;  %1084 = vmatpush.msrb.mxu1 %v2789_v16 }
 0x1eb   :  { %1104 = vmatpush.msrb.mxu2 %v3223_v22  ;;  %1124 = vmatpush.msrb.mxu3 %v3224_v23  ;;  %v3255_v23 = vld [vmem:[#allocation50_spill] sm:$0xff] }
 0x1ec   :  { %1065 = vmatpush.msrb.mxu0 %v3225_v24  ;;  %1085 = vmatpush.msrb.mxu1 %v3226_v25 }
 0x1ed   :  { %1105 = vmatpush.msrb.mxu2 %v3227_v27  ;;  %1125 = vmatpush.msrb.mxu3 %v3228_v28 }
 0x249   :  { %v765_v20 = vpop.f32.mrf.mxu0  ;;  %v785_v19 = vpop.f32.mrf.mxu1 }
 0x24a   :  { %v828_v21 = vadd.f32 %v765_v20, %v3253_v18  ;;  %v829_v15 = vadd.f32 %v785_v19, %v3254_v17  ;;  %v3256_v17 = vld [vmem:[#allocation49_spill] sm:$0xff] }
 0x24c   :  { %v1716_v14 = vmul.f32 -1.442695, %v828_v21  ;;  %v1717_v16 = vmul.f32 -1.442695, %v829_v15 }
 0x24e   :  { %1778 = vpow2.f32 %v1716_v14 }
 0x24f   :  { %1780 = vpow2.f32 %v1717_v16 }
 0x250   :  { %v825_v22 = vpop.f32.mrf.mxu3  ;;  %v805_v28 = vpop.f32.mrf.mxu2 }
 0x251   :  { %v831_v11 = vadd.f32 %v825_v22, %v3255_v23  ;;  %v830_v19 = vadd.f32 %v805_v28, %v3256_v17 }
 0x253   :  { %v1718_v24 = vmul.f32 -1.442695, %v831_v11 }
 0x254   :  { %v1779_v10 = vpop.eup %1778 }
 0x255   :  { %v1781_v25 = vpop.eup %1780  ;;  %v835_v9 = vadd.f32 1.0, %v1779_v10  ;;  %1782 = vpow2.f32 %v1718_v24 }
 0x256   :  { %v854_v27 = vadd.f32 1.0, %v1781_v25 }
 0x257   :  { %1784 = vrcp.f32 %v835_v9  ;;  %v847_v11 = vand.u32 2147483648, %v835_v9  ;;  %v845_v24 = vand.u32 2147483647, %v835_v9  ;;  %vm841_vm10 = vweird.f32 %v835_v9 }
 0x258   :  { %1786 = vrcp.f32 %v854_v27  ;;  %v866_v23 = vand.u32 2147483648, %v854_v27  ;;  %v864_v7 = vand.u32 2147483647, %v854_v27  ;;  %vm860_vm11 = vweird.f32 %v854_v27 }
 0x259   :  { %v848_v28 = vor.u32 1.1754944e-38, %v847_v11  ;;  %vm846_vm14 = vcmp.eq.f32.partialorder %v845_v24, 8.507059e+37 }
 0x25a   :  { %vm865_vm15 = vcmp.eq.f32.partialorder %v864_v7, 8.507059e+37 }
 0x25b   :  { %v1783_v8 = vpop.eup %1782 }
 0x25c   :  { %v874_v18 = vadd.f32 1.0, %v1783_v8 }
 0x25d   :  { %v1785_v20 = vpop.eup %1784 }
 0x25e   :  { %v1787_v15 = vpop.eup %1786  ;;  %v837_v14 = vmul.f32 %v1785_v20, %v835_v9  ;;  %1788 = vrcp.f32 %v874_v18  ;;  %vm842_vm8 = vweird.f32 %v1785_v20  ;;  %v886_v11 = vand.u32 2147483648, %v874_v18 }
 0x25f   :  { %v856_v16 = vmul.f32 %v1787_v15, %v854_v27  ;;  %1790 = vtanh.f32 %v830_v19  ;;  %vm861_vm9 = vweird.f32 %v1787_v15  ;;  %vm843_vm12 = vmor %vm841_vm10, %vm842_vm8  ;;  %vm880_vm1 = vweird.f32 %v874_v18 }
 0x260   :  { %v838_v21 = vsub.f32 1.0, %v837_v14  ;;  %vm862_vm13 = vmor %vm860_vm11, %vm861_vm9  ;;  %v867_v14 = vor.u32 1.1754944e-38, %v866_v23  ;;  %v887_v24 = vor.u32 1.1754944e-38, %v886_v11  ;;  %v3275_v11 = vld [vmem:[#allocation35_spill] sm:$0xff] }
 0x261   :  { %v857_v22 = vsub.f32 1.0, %v856_v16 }
 0x262   :  { %v839_v10 = vmul.f32 %v1785_v20, %v838_v21 }
 0x263   :  { %v858_v25 = vmul.f32 %v1787_v15, %v857_v22 }
 0x264   :  { %v1789_v6 = vpop.eup %1788  ;;  %v840_v8 = vadd.f32 %v1785_v20, %v839_v10 }
 0x265   :  { %v859_v17 = vadd.f32 %v1787_v15, %v858_v25  ;;  %v876_v5 = vmul.f32 %v1789_v6, %v874_v18  ;;  %v1791_v19 = vpop.eup %1790  ;;  %vm881_vm0 = vweird.f32 %v1789_v6  ;;  %v3264_v25 = vld [vmem:[#allocation24_spill] sm:$0xff] }
 0x266   :  { %v844_v16 = vsel %vm843_vm12, %v1785_v20, %v840_v8  ;;  %v884_v20 = vand.u32 2147483647, %v874_v18  ;;  %vm882_vm2 = vmor %vm880_vm1, %vm881_vm0  ;;  %v3263_v18 = vld [vmem:[#allocation23_spill] sm:$0xff]  ;;  %v3265_v8 = vld [vmem:[#allocation26_spill] sm:$0xff] }
 0x267   :  { %v849_v4 = vsel %vm846_vm14, %v848_v28, %v844_v16  ;;  %v863_v21 = vsel %vm862_vm13, %v1787_v15, %v859_v17  ;;  %v877_v3 = vsub.f32 1.0, %v876_v5  ;;  %v3266_v28 = vld [vmem:[#allocation25_spill] sm:$0xff]  ;;  %v3267_v17 = vld [vmem:[#allocation27_spill] sm:$0xff]  ;;  %v3269_v16 = vld [vmem:[#allocation30_spill] sm:$0xff] }
 0x268   :  { %v868_v22 = vsel %vm865_vm15, %v867_v14, %v863_v21  ;;  %v891_v2 = vmul.f32 %v1791_v19, %v849_v4  ;;  %vm885_vm3 = vcmp.eq.f32.partialorder %v884_v20, 8.507059e+37  ;;  %v3261_v4 = vld [vmem:[#allocation22_spill] sm:$0xff]  ;;  %v3268_v14 = vld [vmem:[#allocation28_spill] sm:$0xff]  ;;  %v3270_v19 = vld [vmem:[#allocation29_spill] sm:$0xff] }
 0x269   :  { %v890_v1 = vmul.f32 %v868_v22, %v2615_v12  ;;  %v878_v10 = vmul.f32 %v1789_v6, %v877_v3  ;;  %v3257_v12 = vld [vmem:[#allocation18_spill] sm:$0xff]  ;;  %v3260_v3 = vld [vmem:[#allocation20_spill] sm:$0xff]  ;;  %v3271_v21 = vld [vmem:[#allocation31_spill] sm:$0xff] }
 0x26a   :  { %v3272_v22 = vld [vmem:[#allocation32_spill] sm:$0xff] }
 0x26b   :  { %v2803_v9 = vadd.f32 %v891_v2, %v890_v1  ;;  %v879_v27 = vadd.f32 %v1789_v6, %v878_v10  ;;  %v3258_v1 = vld [vmem:[#allocation17_spill] sm:$0xff]  ;;  %v3259_v2 = vld [vmem:[#allocation19_spill] sm:$0xff]  ;;  %v3273_v10 = vld [vmem:[#allocation34_spill] sm:$0xff] }
 0x26c   :  { %v3276_v20 = vld [vmem:[#allocation36_spill] sm:$0xff] }
 0x26d   :  { %1792 = vtanh.f32 %v2803_v9  ;;  %v883_v23 = vsel %vm882_vm2, %v1789_v6, %v879_v27  ;;  %v3262_v6 = vld [vmem:[#allocation21_spill] sm:$0xff] }
 0x26e   :  { %v888_v5 = vsel %vm885_vm3, %v887_v24, %v883_v23  ;;  %v3274_v27 = vld [vmem:[#allocation33_spill] sm:$0xff]  ;;  %v2867_v24 = vld [vmem:[#allocation8 + $0x38] sm:$0xff] }
 0x26f   :  { %v2864_v23 = vld [vmem:[#allocation8 + $0x30] sm:$0xff]  ;;  %3278 = vst [vmem:[#allocation38_spill] sm:$0xff] %v2867_v24 }
 0x270   :  { %3277 = vst [vmem:[#allocation37_spill] sm:$0xff] %v2864_v23 }
 0x273   :  { %v1793_v7 = vpop.eup %1792 }
 0x274   :  { %v894_v15 = vmul.f32 %v1793_v7, %v888_v5  ;;  %v2870_v7 = vld [vmem:[#allocation8] sm:$0xff]  ;;  %v2873_v5 = vld [vmem:[#allocation8 + $0x8] sm:$0xff] }
 0x275   :  { %3279 = vst [vmem:[#allocation39_spill] sm:$0xff] %v2870_v7 }
 0x276   :  { %915 = vmatmul.f32.vlgmr.msra.gmra.mxu0 %v894_v15  ;;  %935 = vmatmul.f32.vlgmr.msra.gmra.mxu1 %v894_v15  ;;  %3280 = vst [vmem:[#allocation40_spill] sm:$0xff] %v2873_v5 }
 0x277   :  { %955 = vmatmul.f32.vlgmr.msra.gmra.mxu2 %v894_v15  ;;  %975 = vmatmul.f32.vlgmr.msra.gmra.mxu3 %v894_v15  ;;  %v2876_v15 = vld [vmem:[#allocation8 + $0x10] sm:$0xff] }
 0x278   :  { %1201 = vmatpush.msra.mxu0 %v2618_v26  ;;  %1221 = vmatpush.msra.mxu1 %v2621_v29  ;;  %3281 = vst [vmem:[#allocation41_spill] sm:$0xff] %v2876_v15 }
 0x279   :  { %1241 = vmatpush.msra.mxu2 %v2624_v30  ;;  %1261 = vmatpush.msra.mxu3 %v2627_v31 }
 0x27a   :  { %1202 = vmatpush.msra.mxu0 %v2630_v32  ;;  %1222 = vmatpush.msra.mxu1 %v2633_v33 }
 0x27b   :  { %1242 = vmatpush.msra.mxu2 %v2636_v34  ;;  %1262 = vmatpush.msra.mxu3 %v2639_v35 }
 0x27c   :  { %1203 = vmatpush.msra.mxu0 %v2642_v36  ;;  %1223 = vmatpush.msra.mxu1 %v2645_v37 }
 0x27d   :  { %1243 = vmatpush.msra.mxu2 %v2648_v38  ;;  %1263 = vmatpush.msra.mxu3 %v2651_v40 }
 0x27e   :  { %1204 = vmatpush.msra.mxu0 %v2654_v41  ;;  %1224 = vmatpush.msra.mxu1 %v2657_v42 }
 0x27f   :  { %1244 = vmatpush.msra.mxu2 %v2660_v43  ;;  %1264 = vmatpush.msra.mxu3 %v2663_v47 }
 0x280   :  { %1205 = vmatpush.msra.mxu0 %v2666_v0  ;;  %1225 = vmatpush.msra.mxu1 %v2669_v46 }
 0x281   :  { %1245 = vmatpush.msra.mxu2 %v2672_v60  ;;  %1265 = vmatpush.msra.mxu3 %v2675_v13 }
 0x282   :  { %1206 = vmatpush.msra.mxu0 %v2678_v61  ;;  %1226 = vmatpush.msra.mxu1 %v2681_v39 }
 0x283   :  { %1246 = vmatpush.msra.mxu2 %v2684_v50  ;;  %1266 = vmatpush.msra.mxu3 %v2687_v63 }
 0x284   :  { %1207 = vmatpush.msra.mxu0 %v2690_v49  ;;  %1227 = vmatpush.msra.mxu1 %v2693_v44 }
 0x285   :  { %1247 = vmatpush.msra.mxu2 %v2696_v45  ;;  %1267 = vmatpush.msra.mxu3 %v2699_v52 }
 0x286   :  { %1208 = vmatpush.msra.mxu0 %v2702_v51  ;;  %1228 = vmatpush.msra.mxu1 %v2705_v56 }
 0x287   :  { %1248 = vmatpush.msra.mxu2 %v2708_v53  ;;  %1268 = vmatpush.msra.mxu3 %v2711_v48 }
 0x288   :  { %1209 = vmatpush.msra.mxu0 %v2714_v54  ;;  %1229 = vmatpush.msra.mxu1 %v2717_v57 }
 0x289   :  { %1249 = vmatpush.msra.mxu2 %v2720_v58  ;;  %1269 = vmatpush.msra.mxu3 %v2723_v62 }
 0x28a   :  { %1210 = vmatpush.msra.mxu0 %v2726_v59  ;;  %1230 = vmatpush.msra.mxu1 %v2729_v55 }
 0x28b   :  { %1250 = vmatpush.msra.mxu2 %v3257_v12  ;;  %1270 = vmatpush.msra.mxu3 %v3258_v1 }
 0x28c   :  { %1211 = vmatpush.msra.mxu0 %v3259_v2  ;;  %1231 = vmatpush.msra.mxu1 %v3260_v3 }
 0x28d   :  { %1251 = vmatpush.msra.mxu2 %v3261_v4  ;;  %1271 = vmatpush.msra.mxu3 %v3262_v6 }
 0x28e   :  { %1212 = vmatpush.msra.mxu0 %v3263_v18  ;;  %1232 = vmatpush.msra.mxu1 %v3264_v25 }
 0x28f   :  { %1252 = vmatpush.msra.mxu2 %v3265_v8  ;;  %1272 = vmatpush.msra.mxu3 %v3266_v28 }
 0x290   :  { %1213 = vmatpush.msra.mxu0 %v3267_v17  ;;  %1233 = vmatpush.msra.mxu1 %v3268_v14 }
 0x291   :  { %1253 = vmatpush.msra.mxu2 %v3269_v16  ;;  %1273 = vmatpush.msra.mxu3 %v3270_v19 }
 0x292   :  { %1214 = vmatpush.msra.mxu0 %v3271_v21  ;;  %1234 = vmatpush.msra.mxu1 %v3272_v22 }
 0x293   :  { %1254 = vmatpush.msra.mxu2 %v3273_v10  ;;  %1274 = vmatpush.msra.mxu3 %v3274_v27  ;;  %v3283_v27 = vld [vmem:[#allocation51_spill] sm:$0xff]  ;;  %v3284_v10 = vld [vmem:[#allocation52_spill] sm:$0xff] }
 0x294   :  { %1215 = vmatpush.msra.mxu0 %v3275_v11  ;;  %1235 = vmatpush.msra.mxu1 %v3276_v20  ;;  %v2879_v20 = vld [vmem:[#allocation8 + $0x18] sm:$0xff] }
 0x295   :  { %1255 = vmatpush.msra.mxu2 %v2864_v23  ;;  %1275 = vmatpush.msra.mxu3 %v2867_v24  ;;  %3282 = vst [vmem:[#allocation42_spill] sm:$0xff] %v2879_v20 }
 0x296   :  { %1216 = vmatpush.msra.mxu0 %v2870_v7  ;;  %1236 = vmatpush.msra.mxu1 %v2873_v5  ;;  %v3285_v5 = vld [vmem:[#allocation54_spill] sm:$0xff] }
 0x297   :  { %1256 = vmatpush.msra.mxu2 %v2876_v15  ;;  %1276 = vmatpush.msra.mxu3 %v2879_v20 }
 0x2f3   :  { %v916_v23 = vpop.f32.mrf.mxu0  ;;  %v936_v11 = vpop.f32.mrf.mxu1 }
 0x2f4   :  { %v979_v24 = vadd.f32 %v916_v23, %v3283_v27  ;;  %v980_v22 = vadd.f32 %v936_v11, %v3284_v10  ;;  %v3286_v10 = vld [vmem:[#allocation53_spill] sm:$0xff] }
 0x2f6   :  { %v1719_v21 = vmul.f32 -1.442695, %v979_v24  ;;  %v1720_v7 = vmul.f32 -1.442695, %v980_v22 }
 0x2f8   :  { %1794 = vpow2.f32 %v1719_v21 }
 0x2f9   :  { %1796 = vpow2.f32 %v1720_v7 }
 0x2fa   :  { %v976_v19 = vpop.f32.mrf.mxu3  ;;  %v956_v20 = vpop.f32.mrf.mxu2 }
 0x2fb   :  { %v982_v16 = vadd.f32 %v976_v19, %v3285_v5  ;;  %v981_v11 = vadd.f32 %v956_v20, %v3286_v10 }
 0x2fd   :  { %v1721_v14 = vmul.f32 -1.442695, %v982_v16 }
 0x2fe   :  { %v1795_v17 = vpop.eup %1794 }
 0x2ff   :  { %v1797_v15 = vpop.eup %1796  ;;  %v986_v28 = vadd.f32 1.0, %v1795_v17  ;;  %1798 = vpow2.f32 %v1721_v14 }
 0x300   :  { %v1005_v8 = vadd.f32 1.0, %v1797_v15 }
 0x301   :  { %1800 = vrcp.f32 %v986_v28  ;;  %v998_v16 = vand.u32 2147483648, %v986_v28  ;;  %v996_v14 = vand.u32 2147483647, %v986_v28  ;;  %vm992_vm6 = vweird.f32 %v986_v28 }
 0x302   :  { %1802 = vrcp.f32 %v1005_v8  ;;  %v1017_v5 = vand.u32 2147483648, %v1005_v8  ;;  %v1015_v18 = vand.u32 2147483647, %v1005_v8  ;;  %vm1011_vm7 = vweird.f32 %v1005_v8 }
 0x303   :  { %v999_v20 = vor.u32 1.1754944e-38, %v998_v16  ;;  %vm997_vm10 = vcmp.eq.f32.partialorder %v996_v14, 8.507059e+37 }
 0x304   :  { %vm1016_vm11 = vcmp.eq.f32.partialorder %v1015_v18, 8.507059e+37 }
 0x305   :  { %v1799_v25 = vpop.eup %1798 }
 0x306   :  { %v1025_v27 = vadd.f32 1.0, %v1799_v25 }
 0x307   :  { %v1801_v23 = vpop.eup %1800 }
 0x308   :  { %v1803_v22 = vpop.eup %1802  ;;  %v988_v21 = vmul.f32 %v1801_v23, %v986_v28  ;;  %1804 = vrcp.f32 %v1025_v27  ;;  %vm993_vm4 = vweird.f32 %v1801_v23  ;;  %v1037_v16 = vand.u32 2147483648, %v1025_v27 }
 0x309   :  { %v1007_v24 = vmul.f32 %v1803_v22, %v1005_v8  ;;  %1806 = vtanh.f32 %v981_v11  ;;  %vm1012_vm5 = vweird.f32 %v1803_v22  ;;  %vm994_vm8 = vmor %vm992_vm6, %vm993_vm4  ;;  %vm1031_vm13 = vweird.f32 %v1025_v27 }
 0x30a   :  { %v989_v7 = vsub.f32 1.0, %v988_v21  ;;  %vm1013_vm9 = vmor %vm1011_vm7, %vm1012_vm5  ;;  %v1018_v21 = vor.u32 1.1754944e-38, %v1017_v5  ;;  %v1038_v14 = vor.u32 1.1754944e-38, %v1037_v16  ;;  %v3305_v16 = vld [vmem:[#allocation35_spill] sm:$0xff] }
 0x30b   :  { %v1008_v19 = vsub.f32 1.0, %v1007_v24 }
 0x30c   :  { %v990_v17 = vmul.f32 %v1801_v23, %v989_v7 }
 0x30d   :  { %v1009_v15 = vmul.f32 %v1803_v22, %v1008_v19 }
 0x30e   :  { %v1805_v6 = vpop.eup %1804  ;;  %v991_v25 = vadd.f32 %v1801_v23, %v990_v17 }
 0x30f   :  { %v1010_v10 = vadd.f32 %v1803_v22, %v1009_v15  ;;  %v1027_v4 = vmul.f32 %v1805_v6, %v1025_v27  ;;  %v1807_v11 = vpop.eup %1806  ;;  %vm1032_vm12 = vweird.f32 %v1805_v6  ;;  %v3294_v15 = vld [vmem:[#allocation24_spill] sm:$0xff] }
 0x310   :  { %v995_v24 = vsel %vm994_vm8, %v1801_v23, %v991_v25  ;;  %v1035_v23 = vand.u32 2147483647, %v1025_v27  ;;  %vm1033_vm14 = vmor %vm1031_vm13, %vm1032_vm12  ;;  %v3293_v27 = vld [vmem:[#allocation23_spill] sm:$0xff]  ;;  %v3295_v25 = vld [vmem:[#allocation26_spill] sm:$0xff] }
 0x311   :  { %v1000_v3 = vsel %vm997_vm10, %v999_v20, %v995_v24  ;;  %v1014_v7 = vsel %vm1013_vm9, %v1803_v22, %v1010_v10  ;;  %v1028_v2 = vsub.f32 1.0, %v1027_v4  ;;  %v3296_v20 = vld [vmem:[#allocation25_spill] sm:$0xff]  ;;  %v3297_v10 = vld [vmem:[#allocation27_spill] sm:$0xff]  ;;  %v3299_v24 = vld [vmem:[#allocation30_spill] sm:$0xff] }
 0x312   :  { %v1019_v19 = vsel %vm1016_vm11, %v1018_v21, %v1014_v7  ;;  %v1042_v1 = vmul.f32 %v1807_v11, %v1000_v3  ;;  %vm1036_vm15 = vcmp.eq.f32.partialorder %v1035_v23, 8.507059e+37  ;;  %v3291_v3 = vld [vmem:[#allocation22_spill] sm:$0xff]  ;;  %v3298_v21 = vld [vmem:[#allocation28_spill] sm:$0xff]  ;;  %v3300_v11 = vld [vmem:[#allocation29_spill] sm:$0xff] }
 0x313   :  { %v1041_v12 = vmul.f32 %v1019_v19, %v2803_v9  ;;  %v1029_v17 = vmul.f32 %v1805_v6, %v1028_v2  ;;  %v3287_v9 = vld [vmem:[#allocation18_spill] sm:$0xff]  ;;  %v3290_v2 = vld [vmem:[#allocation20_spill] sm:$0xff]  ;;  %v3301_v7 = vld [vmem:[#allocation31_spill] sm:$0xff] }
 0x314   :  { %v3302_v19 = vld [vmem:[#allocation32_spill] sm:$0xff] }
 0x315   :  { %v2887_v28 = vadd.f32 %v1042_v1, %v1041_v12  ;;  %v1030_v8 = vadd.f32 %v1805_v6, %v1029_v17  ;;  %v3288_v12 = vld [vmem:[#allocation17_spill] sm:$0xff]  ;;  %v3289_v1 = vld [vmem:[#allocation19_spill] sm:$0xff]  ;;  %v3303_v17 = vld [vmem:[#allocation34_spill] sm:$0xff] }
 0x316   :  { %v3306_v23 = vld [vmem:[#allocation36_spill] sm:$0xff] }
 0x317   :  { %1808 = vtanh.f32 %v2887_v28  ;;  %v1034_v5 = vsel %vm1033_vm14, %v1805_v6, %v1030_v8  ;;  %v3292_v6 = vld [vmem:[#allocation21_spill] sm:$0xff] }
 0x318   :  { %v1039_v4 = vsel %vm1036_vm15, %v1038_v14, %v1034_v5  ;;  %v3304_v8 = vld [vmem:[#allocation33_spill] sm:$0xff]  ;;  %v3308_v14 = vld [vmem:[#allocation38_spill] sm:$0xff] }
 0x319   :  { %v3307_v5 = vld [vmem:[#allocation37_spill] sm:$0xff] }
 0x31d   :  { %v1809_v18 = vpop.eup %1808 }
 0x31e   :  { %v1045_v22 = vmul.f32 %v1809_v18, %v1039_v4  ;;  %v3309_v18 = vld [vmem:[#allocation39_spill] sm:$0xff]  ;;  %v3310_v4 = vld [vmem:[#allocation40_spill] sm:$0xff] }
 0x320   :  { %1066 = vmatmul.f32.vlgmr.msrb.gmra.mxu0 %v1045_v22  ;;  %1086 = vmatmul.f32.vlgmr.msrb.gmra.mxu1 %v1045_v22 }
 0x321   :  { %1106 = vmatmul.f32.vlgmr.msrb.gmra.mxu2 %v1045_v22  ;;  %1126 = vmatmul.f32.vlgmr.msrb.gmra.mxu3 %v1045_v22  ;;  %v3311_v22 = vld [vmem:[#allocation41_spill] sm:$0xff] }
 0x322   :  { %1352 = vmatpush.msrb.mxu0 %v2618_v26  ;;  %1372 = vmatpush.msrb.mxu1 %v2621_v29 }
 0x323   :  { %1392 = vmatpush.msrb.mxu2 %v2624_v30  ;;  %1412 = vmatpush.msrb.mxu3 %v2627_v31 }
 0x324   :  { %1353 = vmatpush.msrb.mxu0 %v2630_v32  ;;  %1373 = vmatpush.msrb.mxu1 %v2633_v33 }
 0x325   :  { %1393 = vmatpush.msrb.mxu2 %v2636_v34  ;;  %1413 = vmatpush.msrb.mxu3 %v2639_v35 }
 0x326   :  { %1354 = vmatpush.msrb.mxu0 %v2642_v36  ;;  %1374 = vmatpush.msrb.mxu1 %v2645_v37 }
 0x327   :  { %1394 = vmatpush.msrb.mxu2 %v2648_v38  ;;  %1414 = vmatpush.msrb.mxu3 %v2651_v40 }
 0x328   :  { %1355 = vmatpush.msrb.mxu0 %v2654_v41  ;;  %1375 = vmatpush.msrb.mxu1 %v2657_v42 }
 0x329   :  { %1395 = vmatpush.msrb.mxu2 %v2660_v43  ;;  %1415 = vmatpush.msrb.mxu3 %v2663_v47 }
 0x32a   :  { %1356 = vmatpush.msrb.mxu0 %v2666_v0  ;;  %1376 = vmatpush.msrb.mxu1 %v2669_v46 }
 0x32b   :  { %1396 = vmatpush.msrb.mxu2 %v2672_v60  ;;  %1416 = vmatpush.msrb.mxu3 %v2675_v13 }
 0x32c   :  { %1357 = vmatpush.msrb.mxu0 %v2678_v61  ;;  %1377 = vmatpush.msrb.mxu1 %v2681_v39 }
 0x32d   :  { %1397 = vmatpush.msrb.mxu2 %v2684_v50  ;;  %1417 = vmatpush.msrb.mxu3 %v2687_v63 }
 0x32e   :  { %1358 = vmatpush.msrb.mxu0 %v2690_v49  ;;  %1378 = vmatpush.msrb.mxu1 %v2693_v44 }
 0x32f   :  { %1398 = vmatpush.msrb.mxu2 %v2696_v45  ;;  %1418 = vmatpush.msrb.mxu3 %v2699_v52 }
 0x330   :  { %1359 = vmatpush.msrb.mxu0 %v2702_v51  ;;  %1379 = vmatpush.msrb.mxu1 %v2705_v56 }
 0x331   :  { %1399 = vmatpush.msrb.mxu2 %v2708_v53  ;;  %1419 = vmatpush.msrb.mxu3 %v2711_v48 }
 0x332   :  { %1360 = vmatpush.msrb.mxu0 %v2714_v54  ;;  %1380 = vmatpush.msrb.mxu1 %v2717_v57 }
 0x333   :  { %1400 = vmatpush.msrb.mxu2 %v2720_v58  ;;  %1420 = vmatpush.msrb.mxu3 %v2723_v62 }
 0x334   :  { %1361 = vmatpush.msrb.mxu0 %v2726_v59  ;;  %1381 = vmatpush.msrb.mxu1 %v2729_v55 }
 0x335   :  { %1401 = vmatpush.msrb.mxu2 %v3287_v9  ;;  %1421 = vmatpush.msrb.mxu3 %v3288_v12 }
 0x336   :  { %1362 = vmatpush.msrb.mxu0 %v3289_v1  ;;  %1382 = vmatpush.msrb.mxu1 %v3290_v2 }
 0x337   :  { %1402 = vmatpush.msrb.mxu2 %v3291_v3  ;;  %1422 = vmatpush.msrb.mxu3 %v3292_v6 }
 0x338   :  { %1363 = vmatpush.msrb.mxu0 %v3293_v27  ;;  %1383 = vmatpush.msrb.mxu1 %v3294_v15 }
 0x339   :  { %1403 = vmatpush.msrb.mxu2 %v3295_v25  ;;  %1423 = vmatpush.msrb.mxu3 %v3296_v20 }
 0x33a   :  { %1364 = vmatpush.msrb.mxu0 %v3297_v10  ;;  %1384 = vmatpush.msrb.mxu1 %v3298_v21 }
 0x33b   :  { %1404 = vmatpush.msrb.mxu2 %v3299_v24  ;;  %1424 = vmatpush.msrb.mxu3 %v3300_v11  ;;  %v3313_v11 = vld [vmem:[#allocation55_spill] sm:$0xff]  ;;  %v3314_v24 = vld [vmem:[#allocation56_spill] sm:$0xff] }
 0x33c   :  { %1365 = vmatpush.msrb.mxu0 %v3301_v7  ;;  %1385 = vmatpush.msrb.mxu1 %v3302_v19  ;;  %v3312_v7 = vld [vmem:[#allocation42_spill] sm:$0xff] }
 0x33d   :  { %1405 = vmatpush.msrb.mxu2 %v3303_v17  ;;  %1425 = vmatpush.msrb.mxu3 %v3304_v8 }
 0x33e   :  { %1366 = vmatpush.msrb.mxu0 %v3305_v16  ;;  %1386 = vmatpush.msrb.mxu1 %v3306_v23 }
 0x33f   :  { %1406 = vmatpush.msrb.mxu2 %v3307_v5  ;;  %1426 = vmatpush.msrb.mxu3 %v3308_v14  ;;  %v3315_v14 = vld [vmem:[#allocation58_spill] sm:$0xff] }
 0x340   :  { %1367 = vmatpush.msrb.mxu0 %v3309_v18  ;;  %1387 = vmatpush.msrb.mxu1 %v3310_v4 }
 0x341   :  { %1407 = vmatpush.msrb.mxu2 %v3311_v22  ;;  %1427 = vmatpush.msrb.mxu3 %v3312_v7 }
 0x39d   :  { %v1067_v19 = vpop.f32.mrf.mxu0  ;;  %v1087_v17 = vpop.f32.mrf.mxu1 }
 0x39e   :  { %v1130_v8 = vadd.f32 %v1067_v19, %v3313_v11  ;;  %v1131_v16 = vadd.f32 %v1087_v17, %v3314_v24  ;;  %v3316_v24 = vld [vmem:[#allocation57_spill] sm:$0xff] }
 0x3a0   :  { %v1722_v21 = vmul.f32 -1.442695, %v1130_v8  ;;  %v1723_v23 = vmul.f32 -1.442695, %v1131_v16 }
 0x3a2   :  { %1810 = vpow2.f32 %v1722_v21 }
 0x3a3   :  { %1812 = vpow2.f32 %v1723_v23 }
 0x3a4   :  { %v1127_v5 = vpop.f32.mrf.mxu3  ;;  %v1107_v7 = vpop.f32.mrf.mxu2 }
 0x3a5   :  { %v1133_v10 = vadd.f32 %v1127_v5, %v3315_v14  ;;  %v1132_v17 = vadd.f32 %v1107_v7, %v3316_v24 }
 0x3a7   :  { %v1724_v18 = vmul.f32 -1.442695, %v1133_v10 }
 0x3a8   :  { %v1811_v20 = vpop.eup %1810 }
 0x3a9   :  { %v1813_v4 = vpop.eup %1812  ;;  %v1137_v25 = vadd.f32 1.0, %v1811_v20  ;;  %1814 = vpow2.f32 %v1724_v18 }
 0x3aa   :  { %v1156_v22 = vadd.f32 1.0, %v1813_v4 }
 0x3ab   :  { %1816 = vrcp.f32 %v1137_v25  ;;  %v1149_v10 = vand.u32 2147483648, %v1137_v25  ;;  %v1147_v18 = vand.u32 2147483647, %v1137_v25  ;;  %vm1143_vm2 = vweird.f32 %v1137_v25 }
 0x3ac   :  { %1818 = vrcp.f32 %v1156_v22  ;;  %v1168_v14 = vand.u32 2147483648, %v1156_v22  ;;  %v1166_v27 = vand.u32 2147483647, %v1156_v22  ;;  %vm1162_vm3 = vweird.f32 %v1156_v22 }
 0x3ad   :  { %v1150_v7 = vor.u32 1.1754944e-38, %v1149_v10  ;;  %vm1148_vm6 = vcmp.eq.f32.partialorder %v1147_v18, 8.507059e+37 }
 0x3ae   :  { %vm1167_vm7 = vcmp.eq.f32.partialorder %v1166_v27, 8.507059e+37 }
 0x3af   :  { %v1815_v15 = vpop.eup %1814 }
 0x3b0   :  { %v1176_v11 = vadd.f32 1.0, %v1815_v15 }
 0x3b1   :  { %v1817_v19 = vpop.eup %1816 }
 0x3b2   :  { %v1819_v8 = vpop.eup %1818  ;;  %v1139_v21 = vmul.f32 %v1817_v19, %v1137_v25  ;;  %1820 = vrcp.f32 %v1176_v11  ;;  %vm1144_vm0 = vweird.f32 %v1817_v19  ;;  %v1188_v10 = vand.u32 2147483648, %v1176_v11 }
 0x3b3   :  { %v1158_v16 = vmul.f32 %v1819_v8, %v1156_v22  ;;  %1822 = vtanh.f32 %v1132_v17  ;;  %vm1163_vm1 = vweird.f32 %v1819_v8  ;;  %vm1145_vm4 = vmor %vm1143_vm2, %vm1144_vm0  ;;  %vm1182_vm9 = vweird.f32 %v1176_v11 }
 0x3b4   :  { %v1140_v23 = vsub.f32 1.0, %v1139_v21  ;;  %vm1164_vm5 = vmor %vm1162_vm3, %vm1163_vm1  ;;  %v1169_v21 = vor.u32 1.1754944e-38, %v1168_v14  ;;  %v1189_v18 = vor.u32 1.1754944e-38, %v1188_v10 }
 0x3b5   :  { %v1159_v5 = vsub.f32 1.0, %v1158_v16 }
 0x3b6   :  { %v1141_v20 = vmul.f32 %v1817_v19, %v1140_v23 }
 0x3b7   :  { %v1160_v4 = vmul.f32 %v1819_v8, %v1159_v5 }
 0x3b8   :  { %v1821_v6 = vpop.eup %1820  ;;  %v1142_v15 = vadd.f32 %v1817_v19, %v1141_v20 }
 0x3b9   :  { %v1161_v24 = vadd.f32 %v1819_v8, %v1160_v4  ;;  %v1178_v3 = vmul.f32 %v1821_v6, %v1176_v11  ;;  %v1823_v17 = vpop.eup %1822  ;;  %vm1183_vm8 = vweird.f32 %v1821_v6 }
 0x3ba   :  { %v1146_v16 = vsel %vm1145_vm4, %v1817_v19, %v1142_v15  ;;  %v1186_v19 = vand.u32 2147483647, %v1176_v11  ;;  %vm1184_vm10 = vmor %vm1182_vm9, %vm1183_vm8  ;;  %v3346_v15 = vld [vmem:[#allocation61_spill] sm:$0xff] }
 0x3bb   :  { %v1151_v2 = vsel %vm1148_vm6, %v1150_v7, %v1146_v16  ;;  %v1165_v23 = vsel %vm1164_vm5, %v1819_v8, %v1161_v24  ;;  %v1179_v1 = vsub.f32 1.0, %v1178_v3 }
 0x3bc   :  { %v1170_v5 = vsel %vm1167_vm7, %v1169_v21, %v1165_v23  ;;  %v1193_v12 = vmul.f32 %v1823_v17, %v1151_v2  ;;  %vm1187_vm11 = vcmp.eq.f32.partialorder %v1186_v19, 8.507059e+37 }
 0x3bd   :  { %v1192_v9 = vmul.f32 %v1170_v5, %v2887_v28  ;;  %v1180_v20 = vmul.f32 %v1821_v6, %v1179_v1 }
 0x3bf   :  { %v2959_v25 = vadd.f32 %v1193_v12, %v1192_v9  ;;  %v1181_v22 = vadd.f32 %v1821_v6, %v1180_v20 }
 0x3c1   :  { %1824 = vtanh.f32 %v2959_v25  ;;  %v1185_v14 = vsel %vm1184_vm10, %v1821_v6, %v1181_v22 }
 0x3c2   :  { %v1190_v3 = vsel %vm1187_vm11, %v1189_v18, %v1185_v14 }
 0x3c7   :  { %v1825_v27 = vpop.eup %1824 }
 0x3c8   :  { %v1196_v8 = vmul.f32 %v1825_v27, %v1190_v3 }
 0x3ca   :  { %1217 = vmatmul.f32.vlgmr.msra.gmra.mxu0 %v1196_v8  ;;  %1237 = vmatmul.f32.vlgmr.msra.gmra.mxu1 %v1196_v8 }
 0x3cb   :  { %1257 = vmatmul.f32.vlgmr.msra.gmra.mxu2 %v1196_v8  ;;  %1277 = vmatmul.f32.vlgmr.msra.gmra.mxu3 %v1196_v8 }
 0x3cc   :  { %1503 = vmatpush.msra.mxu0 %v2618_v26  ;;  %1523 = vmatpush.msra.mxu1 %v2621_v29  ;;  %v3317_v26 = vld [vmem:[#allocation18_spill] sm:$0xff]  ;;  %v3318_v29 = vld [vmem:[#allocation17_spill] sm:$0xff] }
 0x3cd   :  { %1543 = vmatpush.msra.mxu2 %v2624_v30  ;;  %1563 = vmatpush.msra.mxu3 %v2627_v31  ;;  %v3319_v30 = vld [vmem:[#allocation19_spill] sm:$0xff]  ;;  %v3320_v31 = vld [vmem:[#allocation20_spill] sm:$0xff] }
 0x3ce   :  { %1504 = vmatpush.msra.mxu0 %v2630_v32  ;;  %1524 = vmatpush.msra.mxu1 %v2633_v33  ;;  %v3321_v32 = vld [vmem:[#allocation22_spill] sm:$0xff]  ;;  %v3322_v33 = vld [vmem:[#allocation21_spill] sm:$0xff] }
 0x3cf   :  { %1544 = vmatpush.msra.mxu2 %v2636_v34  ;;  %1564 = vmatpush.msra.mxu3 %v2639_v35  ;;  %v3323_v34 = vld [vmem:[#allocation23_spill] sm:$0xff]  ;;  %v3324_v35 = vld [vmem:[#allocation24_spill] sm:$0xff] }
 0x3d0   :  { %1505 = vmatpush.msra.mxu0 %v2642_v36  ;;  %1525 = vmatpush.msra.mxu1 %v2645_v37  ;;  %v3325_v36 = vld [vmem:[#allocation26_spill] sm:$0xff]  ;;  %v3326_v37 = vld [vmem:[#allocation25_spill] sm:$0xff] }
 0x3d1   :  { %1545 = vmatpush.msra.mxu2 %v2648_v38  ;;  %1565 = vmatpush.msra.mxu3 %v2651_v40  ;;  %v3327_v38 = vld [vmem:[#allocation27_spill] sm:$0xff]  ;;  %v3328_v40 = vld [vmem:[#allocation28_spill] sm:$0xff] }
 0x3d2   :  { %1506 = vmatpush.msra.mxu0 %v2654_v41  ;;  %1526 = vmatpush.msra.mxu1 %v2657_v42  ;;  %v3329_v41 = vld [vmem:[#allocation30_spill] sm:$0xff]  ;;  %v3330_v42 = vld [vmem:[#allocation29_spill] sm:$0xff] }
 0x3d3   :  { %1546 = vmatpush.msra.mxu2 %v2660_v43  ;;  %1566 = vmatpush.msra.mxu3 %v2663_v47  ;;  %v3331_v43 = vld [vmem:[#allocation31_spill] sm:$0xff]  ;;  %v3332_v47 = vld [vmem:[#allocation32_spill] sm:$0xff] }
 0x3d4   :  { %1507 = vmatpush.msra.mxu0 %v2666_v0  ;;  %1527 = vmatpush.msra.mxu1 %v2669_v46  ;;  %v3333_v0 = vld [vmem:[#allocation34_spill] sm:$0xff]  ;;  %v3334_v46 = vld [vmem:[#allocation33_spill] sm:$0xff] }
 0x3d5   :  { %1547 = vmatpush.msra.mxu2 %v2672_v60  ;;  %1567 = vmatpush.msra.mxu3 %v2675_v13  ;;  %v3335_v60 = vld [vmem:[#allocation35_spill] sm:$0xff]  ;;  %v3336_v13 = vld [vmem:[#allocation36_spill] sm:$0xff] }
 0x3d6   :  { %1508 = vmatpush.msra.mxu0 %v2678_v61  ;;  %1528 = vmatpush.msra.mxu1 %v2681_v39  ;;  %v3337_v61 = vld [vmem:[#allocation37_spill] sm:$0xff]  ;;  %v3338_v39 = vld [vmem:[#allocation38_spill] sm:$0xff] }
 0x3d7   :  { %1548 = vmatpush.msra.mxu2 %v2684_v50  ;;  %1568 = vmatpush.msra.mxu3 %v2687_v63  ;;  %v3339_v50 = vld [vmem:[#allocation39_spill] sm:$0xff]  ;;  %v3340_v63 = vld [vmem:[#allocation40_spill] sm:$0xff] }
 0x3d8   :  { %1509 = vmatpush.msra.mxu0 %v2690_v49  ;;  %1529 = vmatpush.msra.mxu1 %v2693_v44  ;;  %v3341_v49 = vld [vmem:[#allocation41_spill] sm:$0xff]  ;;  %v3342_v44 = vld [vmem:[#allocation42_spill] sm:$0xff] }
 0x3d9   :  { %1549 = vmatpush.msra.mxu2 %v2696_v45  ;;  %1569 = vmatpush.msra.mxu3 %v2699_v52 }
 0x3da   :  { %1510 = vmatpush.msra.mxu0 %v2702_v51  ;;  %1530 = vmatpush.msra.mxu1 %v2705_v56  ;;  %v3343_v51 = vld [vmem:[#allocation59_spill] sm:$0xff] }
 0x3db   :  { %1550 = vmatpush.msra.mxu2 %v2708_v53  ;;  %1570 = vmatpush.msra.mxu3 %v2711_v48  ;;  %v3344_v53 = vld [vmem:[#allocation60_spill] sm:$0xff] }
 0x3dc   :  { %1511 = vmatpush.msra.mxu0 %v2714_v54  ;;  %1531 = vmatpush.msra.mxu1 %v2717_v57 }
 0x3dd   :  { %1551 = vmatpush.msra.mxu2 %v2720_v58  ;;  %1571 = vmatpush.msra.mxu3 %v2723_v62  ;;  %v3345_v62 = vld [vmem:[#allocation62_spill] sm:$0xff] }
 0x3de   :  { %1512 = vmatpush.msra.mxu0 %v2726_v59  ;;  %1532 = vmatpush.msra.mxu1 %v2729_v55 }
 0x3df   :  { %1552 = vmatpush.msra.mxu2 %v3317_v26  ;;  %1572 = vmatpush.msra.mxu3 %v3318_v29 }
 0x3e0   :  { %1513 = vmatpush.msra.mxu0 %v3319_v30  ;;  %1533 = vmatpush.msra.mxu1 %v3320_v31 }
 0x3e1   :  { %1553 = vmatpush.msra.mxu2 %v3321_v32  ;;  %1573 = vmatpush.msra.mxu3 %v3322_v33 }
 0x3e2   :  { %1514 = vmatpush.msra.mxu0 %v3323_v34  ;;  %1534 = vmatpush.msra.mxu1 %v3324_v35 }
 0x3e3   :  { %1554 = vmatpush.msra.mxu2 %v3325_v36  ;;  %1574 = vmatpush.msra.mxu3 %v3326_v37 }
 0x3e4   :  { %1515 = vmatpush.msra.mxu0 %v3327_v38  ;;  %1535 = vmatpush.msra.mxu1 %v3328_v40 }
 0x3e5   :  { %1555 = vmatpush.msra.mxu2 %v3329_v41  ;;  %1575 = vmatpush.msra.mxu3 %v3330_v42 }
 0x3e6   :  { %1516 = vmatpush.msra.mxu0 %v3331_v43  ;;  %1536 = vmatpush.msra.mxu1 %v3332_v47 }
 0x3e7   :  { %1556 = vmatpush.msra.mxu2 %v3333_v0  ;;  %1576 = vmatpush.msra.mxu3 %v3334_v46 }
 0x3e8   :  { %1517 = vmatpush.msra.mxu0 %v3335_v60  ;;  %1537 = vmatpush.msra.mxu1 %v3336_v13 }
 0x3e9   :  { %1557 = vmatpush.msra.mxu2 %v3337_v61  ;;  %1577 = vmatpush.msra.mxu3 %v3338_v39  ;;  %v3347_v39 = vld [vmem:[#allocation63_spill] sm:$0xff] }
 0x3ea   :  { %1518 = vmatpush.msra.mxu0 %v3339_v50  ;;  %1538 = vmatpush.msra.mxu1 %v3340_v63  ;;  %v3348_v63 = vld [vmem:[#allocation64_spill] sm:$0xff] }
 0x3eb   :  { %1558 = vmatpush.msra.mxu2 %v3341_v49  ;;  %1578 = vmatpush.msra.mxu3 %v3342_v44 }
 0x447   :  { %v1218_v45 = vpop.f32.mrf.mxu0  ;;  %v1238_v52 = vpop.f32.mrf.mxu1 }
 0x448   :  { %v1281_v56 = vadd.f32 %v1218_v45, %v3343_v51  ;;  %v1282_v48 = vadd.f32 %v1238_v52, %v3344_v53  ;;  %v3349_v51 = vld [vmem:[#allocation66_spill] sm:$0xff] }
 0x44a   :  { %v1725_v54 = vmul.f32 -1.442695, %v1281_v56  ;;  %v1726_v57 = vmul.f32 -1.442695, %v1282_v48 }
 0x44c   :  { %1826 = vpow2.f32 %v1725_v54 }
 0x44d   :  { %1828 = vpow2.f32 %v1726_v57 }
 0x44e   :  { %v1278_v58 = vpop.f32.mrf.mxu3  ;;  %v1258_v2 = vpop.f32.mrf.mxu2 }
 0x44f   :  { %v1284_v59 = vadd.f32 %v1278_v58, %v3345_v62  ;;  %v1283_v7 = vadd.f32 %v1258_v2, %v3346_v15 }
 0x451   :  { %v1727_v55 = vmul.f32 -1.442695, %v1284_v59 }
 0x452   :  { %v1827_v28 = vpop.eup %1826 }
 0x453   :  { %v1829_v9 = vpop.eup %1828  ;;  %v1288_v12 = vadd.f32 1.0, %v1827_v28  ;;  %1830 = vpow2.f32 %v1727_v55 }
 0x454   :  { %v1307_v1 = vadd.f32 1.0, %v1829_v9  ;;  %v3350_v9 = vld [vmem:[#allocation65_spill] sm:$0xff] }
 0x455   :  { %1832 = vrcp.f32 %v1288_v12  ;;  %v1300_v5 = vand.u32 2147483648, %v1288_v12  ;;  %v1298_v10 = vand.u32 2147483647, %v1288_v12  ;;  %vm1294_vm14 = vweird.f32 %v1288_v12 }
 0x456   :  { %1834 = vrcp.f32 %v1307_v1  ;;  %v1319_v20 = vand.u32 2147483648, %v1307_v1  ;;  %v1317_v14 = vand.u32 2147483647, %v1307_v1  ;;  %vm1313_vm15 = vweird.f32 %v1307_v1 }
 0x457   :  { %v1301_v3 = vor.u32 1.1754944e-38, %v1300_v5  ;;  %vm1299_vm2 = vcmp.eq.f32.partialorder %v1298_v10, 8.507059e+37 }
 0x458   :  { %v1320_v29 = vor.u32 1.1754944e-38, %v1319_v20  ;;  %vm1318_vm3 = vcmp.eq.f32.partialorder %v1317_v14, 8.507059e+37 }
 0x459   :  { %v1831_v6 = vpop.eup %1830 }
 0x45a   :  { %v1327_v11 = vadd.f32 1.0, %v1831_v6 }
 0x45b   :  { %v1833_v4 = vpop.eup %1832 }
 0x45c   :  { %v1835_v24 = vpop.eup %1834  ;;  %v1290_v21 = vmul.f32 %v1833_v4, %v1288_v12  ;;  %1836 = vrcp.f32 %v1327_v11  ;;  %vm1295_vm12 = vweird.f32 %v1833_v4  ;;  %v1339_v42 = vand.u32 2147483648, %v1327_v11 }
 0x45d   :  { %v1309_v16 = vmul.f32 %v1835_v24, %v1307_v1  ;;  %1838 = vtanh.f32 %v1283_v7  ;;  %vm1314_vm13 = vweird.f32 %v1835_v24  ;;  %vm1296_vm0 = vmor %vm1294_vm14, %vm1295_vm12  ;;  %vm1333_vm5 = vweird.f32 %v1327_v11 }
 0x45e   :  { %v1291_v17 = vsub.f32 1.0, %v1290_v21  ;;  %vm1315_vm1 = vmor %vm1313_vm15, %vm1314_vm13  ;;  %v1337_v43 = vand.u32 2147483647, %v1327_v11  ;;  %v1340_v0 = vor.u32 1.1754944e-38, %v1339_v42 }
 0x45f   :  { %v1310_v23 = vsub.f32 1.0, %v1309_v16 }
 0x460   :  { %v1292_v22 = vmul.f32 %v1833_v4, %v1291_v17  ;;  %vm1338_vm7 = vcmp.eq.f32.partialorder %v1337_v43, 8.507059e+37  ;;  %v1664_v43 = vld [vmem:[#allocation11 + $0x70] sm:$0xff] }
 0x461   :  { %v1311_v19 = vmul.f32 %v1835_v24, %v1310_v23 }
 0x462   :  { %v1837_v18 = vpop.eup %1836  ;;  %v1293_v27 = vadd.f32 %v1833_v4, %v1292_v22 }
 0x463   :  { %v1312_v8 = vadd.f32 %v1835_v24, %v1311_v19  ;;  %v1329_v26 = vmul.f32 %v1837_v18, %v1327_v11  ;;  %v1839_v31 = vpop.eup %1838  ;;  %vm1334_vm4 = vweird.f32 %v1837_v18 }
 0x464   :  { %v1297_v30 = vsel %vm1296_vm0, %v1833_v4, %v1293_v27  ;;  %vm1335_vm6 = vmor %vm1333_vm5, %vm1334_vm4 }
 0x465   :  { %v1302_v32 = vsel %vm1299_vm2, %v1301_v3, %v1297_v30  ;;  %v1316_v33 = vsel %vm1315_vm1, %v1835_v24, %v1312_v8  ;;  %v1330_v34 = vsub.f32 1.0, %v1329_v26 }
 0x466   :  { %v1321_v35 = vsel %vm1318_vm3, %v1320_v29, %v1316_v33  ;;  %v1344_v36 = vmul.f32 %v1839_v31, %v1302_v32 }
 0x467   :  { %v1343_v37 = vmul.f32 %v1321_v35, %v2959_v25  ;;  %v1331_v38 = vmul.f32 %v1837_v18, %v1330_v34 }
 0x469   :  { %v3031_v40 = vadd.f32 %v1344_v36, %v1343_v37  ;;  %v1332_v41 = vadd.f32 %v1837_v18, %v1331_v38 }
 0x46b   :  { %1840 = vtanh.f32 %v3031_v40  ;;  %v1336_v47 = vsel %vm1335_vm6, %v1837_v18, %v1332_v41 }
 0x46c   :  { %v1341_v60 = vsel %vm1338_vm7, %v1340_v0, %v1336_v47  ;;  %v1663_v47 = vld [vmem:[#allocation11 + $0x68] sm:$0xff]  ;;  %v1662_v0 = vld [vmem:[#allocation11 + $0x60] sm:$0xff] }
 0x471   :  { %v1841_v46 = vpop.eup %1840 }
 0x472   :  { %v1347_v13 = vmul.f32 %v1841_v46, %v1341_v60  ;;  %v1661_v46 = vld [vmem:[#allocation11 + $0x58] sm:$0xff]  ;;  %v1660_v60 = vld [vmem:[#allocation11 + $0x50] sm:$0xff] }
 0x474   :  { %1368 = vmatmul.f32.vlgmr.msrb.gmra.mxu0 %v1347_v13  ;;  %1388 = vmatmul.f32.vlgmr.msrb.gmra.mxu1 %v1347_v13 }
 0x475   :  { %1408 = vmatmul.f32.vlgmr.msrb.gmra.mxu2 %v1347_v13  ;;  %1428 = vmatmul.f32.vlgmr.msrb.gmra.mxu3 %v1347_v13  ;;  %v1659_v13 = vld [vmem:[#allocation11 + $0x48] sm:$0xff] }
 0x4f1   :  { %v1369_v25 = vpop.f32.mrf.mxu0  ;;  %v1389_v61 = vpop.f32.mrf.mxu1 }
 0x4f2   :  { %v1432_v50 = vadd.f32 %v1369_v25, %v3347_v39  ;;  %v1433_v49 = vadd.f32 %v1389_v61, %v3348_v63  ;;  %v1658_v25 = vld [vmem:[#allocation11 + $0x40] sm:$0xff]  ;;  %v1657_v61 = vld [vmem:[#allocation11 + $0x38] sm:$0xff]  ;;  %v1656_v39 = vld [vmem:[#allocation11 + $0x30] sm:$0xff] }
 0x4f4   :  { %v1728_v44 = vmul.f32 -1.442695, %v1432_v50  ;;  %v1729_v45 = vmul.f32 -1.442695, %v1433_v49  ;;  %v3351_v49 = vld [vmem:[#allocation67_spill] sm:$0xff] }
 0x4f6   :  { %1842 = vpow2.f32 %v1728_v44 }
 0x4f7   :  { %1844 = vpow2.f32 %v1729_v45  ;;  %v3352_v45 = vld [vmem:[#allocation68_spill] sm:$0xff] }
 0x4f8   :  { %v1429_v52 = vpop.f32.mrf.mxu3  ;;  %v1409_v62 = vpop.f32.mrf.mxu2 }
 0x4f9   :  { %v1435_v56 = vadd.f32 %v1429_v52, %v3349_v51  ;;  %v1434_v12 = vadd.f32 %v1409_v62, %v3350_v9  ;;  %v1655_v51 = vld [vmem:[#allocation11 + $0x28] sm:$0xff] }
 0x4fa   :  { %v1651_v62 = vld [vmem:[#allocation11 + $0x8] sm:$0xff] }
 0x4fb   :  { %v1730_v53 = vmul.f32 -1.442695, %v1435_v56 }
 0x4fc   :  { %v1843_v48 = vpop.eup %1842 }
 0x4fd   :  { %v1845_v54 = vpop.eup %1844  ;;  %v1439_v57 = vadd.f32 1.0, %v1843_v48  ;;  %1846 = vpow2.f32 %v1730_v53  ;;  %v1654_v48 = vld [vmem:[#allocation11 + $0x20] sm:$0xff] }
 0x4fe   :  { %v1458_v58 = vadd.f32 1.0, %v1845_v54  ;;  %v1653_v54 = vld [vmem:[#allocation11 + $0x18] sm:$0xff] }
 0x4ff   :  { %1848 = vrcp.f32 %v1439_v57  ;;  %v1451_v15 = vand.u32 2147483648, %v1439_v57  ;;  %v1449_v21 = vand.u32 2147483647, %v1439_v57  ;;  %vm1445_vm10 = vweird.f32 %v1439_v57 }
 0x500   :  { %1850 = vrcp.f32 %v1458_v58  ;;  %v1470_v7 = vand.u32 2147483648, %v1458_v58  ;;  %v1468_v17 = vand.u32 2147483647, %v1458_v58  ;;  %vm1464_vm11 = vweird.f32 %v1458_v58 }
 0x501   :  { %v1452_v20 = vor.u32 1.1754944e-38, %v1451_v15  ;;  %vm1450_vm14 = vcmp.eq.f32.partialorder %v1449_v21, 8.507059e+37 }
 0x502   :  { %v1471_v19 = vor.u32 1.1754944e-38, %v1470_v7  ;;  %vm1469_vm15 = vcmp.eq.f32.partialorder %v1468_v17, 8.507059e+37 }
 0x503   :  { %v1847_v59 = vpop.eup %1846 }
 0x504   :  { %v1478_v55 = vadd.f32 1.0, %v1847_v59  ;;  %v3353_v59 = vld [vmem:[#allocation70_spill] sm:$0xff] }
 0x505   :  { %v1849_v28 = vpop.eup %1848 }
 0x506   :  { %v1851_v1 = vpop.eup %1850  ;;  %v1441_v2 = vmul.f32 %v1849_v28, %v1439_v57  ;;  %1852 = vrcp.f32 %v1478_v55  ;;  %vm1446_vm8 = vweird.f32 %v1849_v28  ;;  %v1490_v34 = vand.u32 2147483648, %v1478_v55  ;;  %v1652_v57 = vld [vmem:[#allocation11 + $0x10] sm:$0xff] }
 0x507   :  { %v1460_v6 = vmul.f32 %v1851_v1, %v1458_v58  ;;  %1854 = vtanh.f32 %v1434_v12  ;;  %vm1465_vm9 = vweird.f32 %v1851_v1  ;;  %vm1447_vm12 = vmor %vm1445_vm10, %vm1446_vm8  ;;  %vm1484_vm1 = vweird.f32 %v1478_v55 }
 0x508   :  { %v1442_v11 = vsub.f32 1.0, %v1441_v2  ;;  %vm1466_vm13 = vmor %vm1464_vm11, %vm1465_vm9  ;;  %v1488_v35 = vand.u32 2147483647, %v1478_v55  ;;  %v1491_v37 = vor.u32 1.1754944e-38, %v1490_v34 }
 0x509   :  { %v1461_v4 = vsub.f32 1.0, %v1460_v6 }
 0x50a   :  { %v1443_v24 = vmul.f32 %v1849_v28, %v1442_v11  ;;  %vm1489_vm3 = vcmp.eq.f32.partialorder %v1488_v35, 8.507059e+37 }
 0x50b   :  { %v1462_v16 = vmul.f32 %v1851_v1, %v1461_v4 }
 0x50c   :  { %v1853_v23 = vpop.eup %1852  ;;  %v1444_v5 = vadd.f32 %v1849_v28, %v1443_v24  ;;  %v3354_v24 = vld [vmem:[#allocation69_spill] sm:$0xff] }
 0x50d   :  { %v1463_v22 = vadd.f32 %v1851_v1, %v1462_v16  ;;  %v1480_v10 = vmul.f32 %v1853_v23, %v1478_v55  ;;  %v1855_v18 = vpop.eup %1854  ;;  %vm1485_vm0 = vweird.f32 %v1853_v23 }
 0x50e   :  { %v1448_v14 = vsel %vm1447_vm12, %v1849_v28, %v1444_v5  ;;  %vm1486_vm2 = vmor %vm1484_vm1, %vm1485_vm0  ;;  %v1650_v28 = vld [vmem:[#allocation11] sm:$0xff] }
 0x50f   :  { %v1453_v27 = vsel %vm1450_vm14, %v1452_v20, %v1448_v14  ;;  %v1467_v3 = vsel %vm1466_vm13, %v1851_v1, %v1463_v22  ;;  %v1481_v8 = vsub.f32 1.0, %v1480_v10 }
 0x510   :  { %v1472_v26 = vsel %vm1469_vm15, %v1471_v19, %v1467_v3  ;;  %v1495_v29 = vmul.f32 %v1855_v18, %v1453_v27 }
 0x511   :  { %v1494_v30 = vmul.f32 %v1472_v26, %v3031_v40  ;;  %v1482_v31 = vmul.f32 %v1853_v23, %v1481_v8  ;;  %v1665_v40 = vld [vmem:[#allocation11 + $0x78] sm:$0xff] }
 0x512   :  { %1670 = vmatpush.msrb.mxu0 %v1665_v40 }
 0x513   :  { %v3039_v32 = vadd.f32 %v1495_v29, %v1494_v30  ;;  %v1483_v33 = vadd.f32 %v1853_v23, %v1482_v31 }
 0x514   :  { %1671 = vmatpush.msrb.mxu0 %v1664_v43 }
 0x515   :  { %1856 = vtanh.f32 %v3039_v32  ;;  %v1487_v36 = vsel %vm1486_vm2, %v1853_v23, %v1483_v33 }
 0x516   :  { %v1492_v41 = vsel %vm1489_vm3, %v1491_v37, %v1487_v36  ;;  %1672 = vmatpush.msrb.mxu0 %v1663_v47 }
 0x518   :  { %1673 = vmatpush.msrb.mxu0 %v1662_v0 }
 0x51a   :  { %1674 = vmatpush.msrb.mxu0 %v1661_v46 }
 0x51b   :  { %v1857_v38 = vpop.eup %1856 }
 0x51c   :  { %v1498_v42 = vmul.f32 %v1857_v38, %v1492_v41  ;;  %1675 = vmatpush.msrb.mxu0 %v1660_v60 }
 0x51e   :  { %1519 = vmatmul.f32.vlgmr.msra.gmra.mxu0 %v1498_v42  ;;  %1539 = vmatmul.f32.vlgmr.msra.gmra.mxu1 %v1498_v42 }
 0x51f   :  { %1559 = vmatmul.f32.vlgmr.msra.gmra.mxu2 %v1498_v42  ;;  %1579 = vmatmul.f32.vlgmr.msra.gmra.mxu3 %v1498_v42 }
 0x520   :  { %1676 = vmatpush.msrb.mxu0 %v1659_v13 }
 0x522   :  { %1677 = vmatpush.msrb.mxu0 %v1658_v25 }
 0x524   :  { %1678 = vmatpush.msrb.mxu0 %v1657_v61 }
 0x526   :  { %1679 = vmatpush.msrb.mxu0 %v1656_v39 }
 0x528   :  { %1680 = vmatpush.msrb.mxu0 %v1655_v51 }
 0x52a   :  { %1681 = vmatpush.msrb.mxu0 %v1654_v48 }
 0x52c   :  { %1682 = vmatpush.msrb.mxu0 %v1653_v54 }
 0x52e   :  { %1683 = vmatpush.msrb.mxu0 %v1652_v57 }
 0x530   :  { %1684 = vmatpush.msrb.mxu0 %v1651_v62 }
 0x532   :  { %1685 = vmatpush.msrb.mxu0 %v1650_v28 }
 0x59b   :  { %v1520_v50 = vpop.f32.mrf.mxu0  ;;  %v1540_v63 = vpop.f32.mrf.mxu1 }
 0x59c   :  { %v1583_v44 = vadd.f32 %v1520_v50, %v3351_v49  ;;  %v1584_v52 = vadd.f32 %v1540_v63, %v3352_v45 }
 0x59e   :  { %v1731_v56 = vmul.f32 -1.442695, %v1583_v44  ;;  %v1732_v53 = vmul.f32 -1.442695, %v1584_v52 }
 0x5a0   :  { %1858 = vpow2.f32 %v1731_v56 }
 0x5a1   :  { %1860 = vpow2.f32 %v1732_v53 }
 0x5a2   :  { %v1580_v58 = vpop.f32.mrf.mxu3  ;;  %v1560_v11 = vpop.f32.mrf.mxu2 }
 0x5a3   :  { %v1586_v55 = vadd.f32 %v1580_v58, %v3353_v59  ;;  %v1585_v21 = vadd.f32 %v1560_v11, %v3354_v24 }
 0x5a5   :  { %v1733_v9 = vmul.f32 -1.442695, %v1586_v55 }
 0x5a6   :  { %v1859_v12 = vpop.eup %1858 }
 0x5a7   :  { %v1861_v1 = vpop.eup %1860  ;;  %v1590_v2 = vadd.f32 1.0, %v1859_v12  ;;  %1862 = vpow2.f32 %v1733_v9 }
 0x5a8   :  { %v1609_v6 = vadd.f32 1.0, %v1861_v1 }
 0x5a9   :  { %1864 = vrcp.f32 %v1590_v2  ;;  %v1602_v22 = vand.u32 2147483648, %v1590_v2  ;;  %v1600_v14 = vand.u32 2147483647, %v1590_v2  ;;  %vm1596_vm6 = vweird.f32 %v1590_v2 }
 0x5aa   :  { %1866 = vrcp.f32 %v1609_v6  ;;  %v1621_v10 = vand.u32 2147483648, %v1609_v6  ;;  %v1619_v27 = vand.u32 2147483647, %v1609_v6  ;;  %vm1615_vm7 = vweird.f32 %v1609_v6 }
 0x5ab   :  { %v1603_v26 = vor.u32 1.1754944e-38, %v1602_v22  ;;  %vm1601_vm10 = vcmp.eq.f32.partialorder %v1600_v14, 8.507059e+37 }
 0x5ac   :  { %v1622_v31 = vor.u32 1.1754944e-38, %v1621_v10  ;;  %vm1620_vm11 = vcmp.eq.f32.partialorder %v1619_v27, 8.507059e+37 }
 0x5ad   :  { %v1863_v4 = vpop.eup %1862 }
 0x5ae   :  { %v1629_v15 = vadd.f32 1.0, %v1863_v4 }
 0x5af   :  { %v1865_v7 = vpop.eup %1864 }
 0x5b0   :  { %v1867_v16 = vpop.eup %1866  ;;  %v1592_v17 = vmul.f32 %v1865_v7, %v1590_v2  ;;  %1868 = vrcp.f32 %v1629_v15  ;;  %vm1597_vm4 = vweird.f32 %v1865_v7  ;;  %v1641_v0 = vand.u32 2147483648, %v1629_v15 }
 0x5b1   :  { %v1611_v23 = vmul.f32 %v1867_v16, %v1609_v6  ;;  %1870 = vtanh.f32 %v1585_v21  ;;  %vm1616_vm5 = vweird.f32 %v1867_v16  ;;  %vm1598_vm8 = vmor %vm1596_vm6, %vm1597_vm4  ;;  %vm1635_vm13 = vweird.f32 %v1629_v15 }
 0x5b2   :  { %v1593_v5 = vsub.f32 1.0, %v1592_v17  ;;  %vm1617_vm9 = vmor %vm1615_vm7, %vm1616_vm5  ;;  %v1639_v46 = vand.u32 2147483647, %v1629_v15  ;;  %v1642_v13 = vor.u32 1.1754944e-38, %v1641_v0 }
 0x5b3   :  { %v1612_v20 = vsub.f32 1.0, %v1611_v23 }
 0x5b4   :  { %v1594_v19 = vmul.f32 %v1865_v7, %v1593_v5  ;;  %vm1640_vm15 = vcmp.eq.f32.partialorder %v1639_v46, 8.507059e+37 }
 0x5b5   :  { %v1613_v18 = vmul.f32 %v1867_v16, %v1612_v20 }
 0x5b6   :  { %v1869_v3 = vpop.eup %1868  ;;  %v1595_v8 = vadd.f32 %v1865_v7, %v1594_v19 }
 0x5b7   :  { %v1614_v29 = vadd.f32 %v1867_v16, %v1613_v18  ;;  %v1631_v30 = vmul.f32 %v1869_v3, %v1629_v15  ;;  %v1871_v34 = vpop.eup %1870  ;;  %vm1636_vm12 = vweird.f32 %v1869_v3 }
 0x5b8   :  { %v1599_v33 = vsel %vm1598_vm8, %v1865_v7, %v1595_v8  ;;  %vm1637_vm14 = vmor %vm1635_vm13, %vm1636_vm12 }
 0x5b9   :  { %v1604_v35 = vsel %vm1601_vm10, %v1603_v26, %v1599_v33  ;;  %v1618_v36 = vsel %vm1617_vm9, %v1867_v16, %v1614_v29  ;;  %v1632_v37 = vsub.f32 1.0, %v1631_v30 }
 0x5ba   :  { %v1623_v38 = vsel %vm1620_vm11, %v1622_v31, %v1618_v36  ;;  %v1646_v41 = vmul.f32 %v1871_v34, %v1604_v35 }
 0x5bb   :  { %v1645_v42 = vmul.f32 %v1623_v38, %v3039_v32  ;;  %v1633_v40 = vmul.f32 %v1869_v3, %v1632_v37  ;;  %v1745_v32 = vld [vmem:[%s3058_s5] ss:$0 sm:$0xff] }
 0x5bd   :  { %v1647_v43 = vadd.f32 %v1646_v41, %v1645_v42  ;;  %v1634_v47 = vadd.f32 %v1869_v3, %v1633_v40 }
 0x5bf   :  { %1872 = vtanh.f32 %v1647_v43  ;;  %v1638_v60 = vsel %vm1637_vm14, %v1869_v3, %v1634_v47 }
 0x5c0   :  { %v1643_v61 = vsel %vm1640_vm15, %v1642_v13, %v1638_v60 }
 0x5c5   :  { %v1873_v25 = vpop.eup %1872 }
 0x5c6   :  { %v1649_v39 = vmul.f32 %v1873_v25, %v1643_v61 }
 0x5c8   :  { %1686 = vmatmul.f32.vlgmr.msrb.gmra.mxu0 %v1649_v39 }
 0x645   :  { %v1687_v50 = vpop.f32.mrf.mxu0 }
 0x646   :  { %v1688_v63 = vadd.f32 %v1745_v32, %v1687_v50 }
 0x648   :  { %1690 = vst [vmem:[#allocation12] sm:$0xff] %v1688_v63 }
 0x649   :  { %1701 = dma.vmem_to_hbm [thread:$0]  %s1697_s24, 128, %s1699_s27, [#allocation5]  }
 0x64a   :  { %2088 = dma.done.wait [#allocation5], 128  }
 0x64b   :  { %2089 = vsyncadd [#allocation5], 4294967168 }
 0x64c   :  { %1706 = vsyncpa [#allocation4], 1 }
 0x64d   :  { %1707 = vsyncpa [#allocation7], 1 }
 0x64e   :  { %1708 = vsyncpa [#allocation10], 1 }
 0x64f   :  { %1709 = vsyncpa [#allocation5], 1 }

</bundles_post_ra>
